<compile_context>
chip_gen: v6e
topology: v6e:2x2x1
jax: 0.10.0
libtpu: 0.0.40
codegen_flags: <defaults>
</compile_context>

<pallas_src>
import functools
import math

import jax
import jax.numpy as jnp
from jax.experimental import pallas as pl
from jax.experimental.pallas import tpu as pltpu


def _round_up(x, m):
    return (x + m - 1) // m * m


# ---------------------------------------------------------------------------
# Fused kernel: embedding gather + attn_layer_a + attn_layer_b + attn_layer_global.
#   ids_ref  : SMEM [(1 + n_a + n_b) * B] int32 (scalar-prefetch)
#   emb_ref  : [V, D]       embedding table (VMEM)
#   blk_ref  : [D, D]       block-diag "same head" matrix with 1/sqrt(hd) folded in
#   wq_ref   : [D, 3D]      fused Q weights (a|b|global), bq_ref: [1, 3D]
#   wkv_*    : [D, 2D]      fused K|V weights per layer,  bkv_*: [1, 2D]
#   out_ref  : [B, D]
#   node_buf : [Bp, D]      scratch (Bp = batch padded to 8 sublanes)
#   na_buf   : [n_a*Bp, D]  scratch, A-neighbor key j occupies rows j*Bp:(j+1)*Bp
#   nb_buf   : [n_b*Bp, D]  scratch, same layout
# ---------------------------------------------------------------------------
def _token_net_kernel(ids_ref, emb_ref, blk_ref,
                      wq_ref, bq_ref,
                      wkv_a_ref, bkv_a_ref,
                      wkv_b_ref, bkv_b_ref,
                      wkv_g_ref, bkv_g_ref,
                      out_ref,
                      node_buf, na_buf, nb_buf,
                      *, n_a, n_b, batch, bp, d):
    # Zero-init padded slabs so pad rows (batch..bp) stay finite; rows never mix.
    node_buf[...] = jnp.zeros_like(node_buf)
    na_buf[...] = jnp.zeros_like(na_buf)
    nb_buf[...] = jnp.zeros_like(nb_buf)

    # ---- fused embedding gather (ids in SMEM, table resident in VMEM) ------
    def gather_row(dst_ref, dst_row, id_pos):
        idx = ids_ref[id_pos]                              # scalar int32 from SMEM
        dst_ref[pl.ds(dst_row, 1), :] = emb_ref[pl.ds(idx, 1), :]

    for b in range(batch):                                 # node features
        gather_row(node_buf, b, b)
    for j in range(n_a):                                   # A-side neighbors
        for b in range(batch):
            gather_row(na_buf, j * bp + b, batch + j * batch + b)
    off = batch * (1 + n_a)
    for j in range(n_b):                                   # B-side neighbors
        for b in range(batch):
            gather_row(nb_buf, j * bp + b, off + j * batch + b)

    node = node_buf[...]                                   # [Bp, D]
    blk = blk_ref[...]                                     # [D, D] (scale folded in)

    # ---- all three Q projections in one MXU push ---------------------------
    q_all = jnp.dot(node, wq_ref[...],
                    preferred_element_type=jnp.float32) + bq_ref[...]   # [Bp, 3D]
    q_a = q_all[:, :d]
    q_b = q_all[:, d:2 * d]
    q_g = q_all[:, 2 * d:]

    def kv_proj(x, wkv_r, bkv_r):
        # [rows, D] -> [rows, 2D]; lanes [0:D) = K, [D:2D) = V.
        return jnp.dot(x, wkv_r[...],
                       preferred_element_type=jnp.float32) + bkv_r[...]

    def attend(q, kv_all, n):
        # q: [Bp, D]; kv_all: [n*Bp, 2D], key slab j at rows j*Bp:(j+1)*Bp.
        # One score matmul for all keys: (q tiled * K) @ blk broadcasts each
        # head's dot product over that head's lanes, so softmax stays
        # full-vreg elementwise (no 32-lane slicing).
        k_all = kv_all[:, :d]
        q_t = jnp.concatenate([q] * n, axis=0)             # [n*Bp, D]
        s_all = jnp.dot(q_t * k_all, blk,
                        preferred_element_type=jnp.float32)  # [n*Bp, D]
        slabs = [s_all[j * bp:(j + 1) * bp, :] for j in range(n)]
        m = functools.reduce(jnp.maximum, slabs)           # stable softmax max
        exps = [jnp.exp(s - m) for s in slabs]
        denom = functools.reduce(jnp.add, exps)
        inv = pl.reciprocal(denom, approx=False)           # EUP slot
        ctx = jnp.zeros_like(q)
        for j in range(n):
            ctx = ctx + (exps[j] * inv) * kv_all[j * bp:(j + 1) * bp, d:]
        return ctx                                         # [Bp, D]

    # --- attn_layer_a --------------------------------------------------------
    kv_a = kv_proj(na_buf[...], wkv_a_ref, bkv_a_ref)      # [n_a*Bp, 2D]
    ctx_a = attend(q_a, kv_a, n_a)

    # --- attn_layer_b --------------------------------------------------------
    kv_b = kv_proj(nb_buf[...], wkv_b_ref, bkv_b_ref)      # [n_b*Bp, 2D]
    ctx_b = attend(q_b, kv_b, n_b)

    # --- attn_layer_global: keys/values = [ctx_a, node, ctx_b] --------------
    g_in = jnp.concatenate([ctx_a, node, ctx_b], axis=0)   # [3*Bp, D], tile-aligned
    kv_g = kv_proj(g_in, wkv_g_ref, bkv_g_ref)
    ctx_g = attend(q_g, kv_g, 3)

    out_ref[...] = ctx_g[:batch, :].astype(out_ref.dtype)


# ---------------------------------------------------------------------------
# One-time parameter preparation (NOT on the per-forward hot path).
# ---------------------------------------------------------------------------
def prepare_token_net_params(params_a, params_b, params_g, num_heads, feature_dim):
    d = feature_dim
    assert d % 128 == 0, "feature_dim must be a multiple of 128 (lane tile)"
    assert d % num_heads == 0, "num_heads must divide feature_dim"
    hd = d // num_heads

    def fuse_kv(p):
        wq, bq, wk, bk, wv, bv = p
        wkv = jnp.concatenate([wk, wv], axis=1)            # [D, 2D]
        bkv = jnp.concatenate([bk, bv]).reshape(1, 2 * d)  # [1, 2D]
        return wq, bq, wkv, bkv

    wq_a, bq_a, wkv_a, bkv_a = fuse_kv(params_a)
    wq_b, bq_b, wkv_b, bkv_b = fuse_kv(params_b)
    wq_g, bq_g, wkv_g, bkv_g = fuse_kv(params_g)

    wq_all = jnp.concatenate([wq_a, wq_b, wq_g], axis=1)            # [D, 3D]
    bq_all = jnp.concatenate([bq_a, bq_b, bq_g]).reshape(1, 3 * d)  # [1, 3D]

    # blk[i, j] = 1/sqrt(hd) iff lanes i and j belong to the same head.
    row = jax.lax.broadcasted_iota(jnp.int32, (d, d), 0) // hd
    col = jax.lax.broadcasted_iota(jnp.int32, (d, d), 1) // hd
    blk_scaled = (row == col).astype(jnp.float32) * (1.0 / math.sqrt(hd))

    prepared = dict(blk=blk_scaled, wq_all=wq_all, bq_all=bq_all,
                    wkv_a=wkv_a, bkv_a=bkv_a,
                    wkv_b=wkv_b, bkv_b=bkv_b,
                    wkv_g=wkv_g, bkv_g=bkv_g)
    return jax.block_until_ready(prepared)                 # materialize once


# ---------------------------------------------------------------------------
# Forward: embedding gather + TokenNet in a single pallas_call.
# ---------------------------------------------------------------------------
def token_net_encoder_forward(emb_table, node_ids, neigh_a_ids, neigh_b_ids,
                              prepared):
    V, D = emb_table.shape
    B = node_ids.shape[0]
    n_a, n_b = len(neigh_a_ids), len(neigh_b_ids)
    Bp = max(8, _round_up(B, 8))                           # pad batch to sublane tile

    # Single tiny int32 concat (the only per-call XLA op besides the kernel).
    ids_flat = jnp.concatenate(
        [node_ids] + list(neigh_a_ids) + list(neigh_b_ids)).astype(jnp.int32)

    kernel = functools.partial(_token_net_kernel,
                               n_a=n_a, n_b=n_b, batch=B, bp=Bp, d=D)

    def full(shape):
        # Whole-array block; full dims satisfy the (8,128) rule.
        return pl.BlockSpec(shape, lambda *_: (0,) * len(shape))

    p = prepared
    in_arrays = (emb_table, p["blk"], p["wq_all"], p["bq_all"],
                 p["wkv_a"], p["bkv_a"], p["wkv_b"], p["bkv_b"],
                 p["wkv_g"], p["bkv_g"])
    in_specs = [full(a.shape) for a in in_arrays]

    # Rough scheduler hint.
    n_keys = n_a + n_b + 3
    flops = (2 * Bp * D * 3 * D                         # fused Q projection
             + 2 * (n_a + n_b + 3) * Bp * D * 2 * D     # KV projections
             + 2 * n_keys * Bp * D * D)                 # score matmuls
    bytes_accessed = (sum(int(a.size) * a.dtype.itemsize for a in in_arrays)
                      + B * D * 4 + int(ids_flat.size) * 4)
    cost = pl.CostEstimate(flops=int(flops),
                           transcendentals=int(n_keys * Bp * D),
                           bytes_accessed=int(bytes_accessed))

    grid_spec = pltpu.PrefetchScalarGridSpec(
        num_scalar_prefetch=1,                          # ids_flat -> SMEM
        grid=(1,),
        in_specs=in_specs,
        out_specs=full((B, D)),
        scratch_shapes=[pltpu.VMEM((Bp, D), jnp.float32),
                        pltpu.VMEM((n_a * Bp, D), jnp.float32),
                        pltpu.VMEM((n_b * Bp, D), jnp.float32)])

    return pl.pallas_call(
        kernel,
        out_shape=jax.ShapeDtypeStruct((B, D), emb_table.dtype),
        grid_spec=grid_spec,
        compiler_params=pltpu.CompilerParams(
            dimension_semantics=("arbitrary",),
            vmem_limit_bytes=32 * 1024 * 1024),
        cost_estimate=cost,
    )(ids_flat, *in_arrays)


# ---------------------------------------------------------------------------
# Pure-JAX reference (mirrors the PyTorch module) for verification.
# ---------------------------------------------------------------------------
def ref_attention_layer(node, neigh, params, num_heads):
    wq, bq, wk, bk, wv, bv = params
    B, Sq, D = node.shape
    Sk = neigh.shape[1]
    hd = D // num_heads
    q = (node @ wq + bq).reshape(B, Sq, num_heads, hd).transpose(0, 2, 1, 3)
    k = (neigh @ wk + bk).reshape(B, Sk, num_heads, hd).transpose(0, 2, 1, 3)
    v = (neigh @ wv + bv).reshape(B, Sk, num_heads, hd).transpose(0, 2, 1, 3)
    s = jnp.einsum("bhqd,bhkd->bhqk", q, k) / math.sqrt(hd)
    p = jax.nn.softmax(s, axis=-1)
    c = jnp.einsum("bhqk,bhkd->bhqd", p, v)
    return c.transpose(0, 2, 1, 3).reshape(B, Sq, D)


def ref_token_net_encoder_forward(emb_table, node_ids, neigh_a_ids, neigh_b_ids,
                                  params_a, params_b, params_g, num_heads):
    node = jnp.take(emb_table, node_ids, axis=0)[:, None, :]              # [B,1,D]
    neigh_a = jnp.stack([jnp.take(emb_table, ids, axis=0) for ids in neigh_a_ids], axis=1)
    neigh_b = jnp.stack([jnp.take(emb_table, ids, axis=0) for ids in neigh_b_ids], axis=1)
    a = ref_attention_layer(node, neigh_a, params_a, num_heads)
    b = ref_attention_layer(node, neigh_b, params_b, num_heads)
    g = jnp.concatenate([a, node, b], axis=1)
    out = ref_attention_layer(node, g, params_g, num_heads)
    return jnp.squeeze(out, axis=1)


def make_attn_params(key, D):
    ks = jax.random.split(key, 6)
    bound = 1.0 / math.sqrt(D)
    wq = jax.random.uniform(ks[0], (D, D), jnp.float32, -bound, bound)
    bq = jax.random.uniform(ks[1], (D,), jnp.float32, -bound, bound)
    wk = jax.random.uniform(ks[2], (D, D), jnp.float32, -bound, bound)
    bk = jax.random.uniform(ks[3], (D,), jnp.float32, -bound, bound)
    wv = jax.random.uniform(ks[4], (D, D), jnp.float32, -bound, bound)
    bv = jax.random.uniform(ks[5], (D,), jnp.float32, -bound, bound)
    return (wq, bq, wk, bk, wv, bv)


if __name__ == "__main__":
    # Small shapes consistent with the module: feature_dim=128 (lane-aligned),
    # 4 attention heads, embedding vocab 64, B=2, 5 A-neighbors, 3 B-neighbors.
    B, D, NUM_HEADS = 2, 128, 4
    N_A, N_B = 5, 3
    VOCAB = 64

    key = jax.random.PRNGKey(0)
    k_emb, k_ids, k_pa, k_pb, k_pg = jax.random.split(key, 5)

    emb_table = jax.random.normal(k_emb, (VOCAB, D), jnp.float32)

    k_node, k_a, k_b = jax.random.split(k_ids, 3)
    node_ids = jax.random.randint(k_node, (B,), 0, VOCAB, dtype=jnp.int32)
    neigh_a_ids = [jax.random.randint(jax.random.fold_in(k_a, i), (B,), 0, VOCAB,
                                      dtype=jnp.int32) for i in range(N_A)]
    neigh_b_ids = [jax.random.randint(jax.random.fold_in(k_b, i), (B,), 0, VOCAB,
                                      dtype=jnp.int32) for i in range(N_B)]

    params_a = make_attn_params(k_pa, D)
    params_b = make_attn_params(k_pb, D)
    params_g = make_attn_params(k_pg, D)

    # One-time weight fusion (hoisted off the per-forward path).
    prepared = prepare_token_net_params(params_a, params_b, params_g, NUM_HEADS, D)

    out = token_net_encoder_forward(emb_table, node_ids, neigh_a_ids, neigh_b_ids,
                                    prepared)
    out = jax.block_until_ready(out)

    ref = ref_token_net_encoder_forward(emb_table, node_ids, neigh_a_ids, neigh_b_ids,
                                        params_a, params_b, params_g, NUM_HEADS)

    assert out.shape == (B, D)
    err = float(jnp.max(jnp.abs(out - ref)))
    assert err < 2e-3, f"Pallas output mismatch vs reference (max abs err {err})"

    print("KERNEL_OK")
</pallas_src>

<mosaic_0001>
module attributes {stable_mosaic.version = 11 : i64} {
  func.func @_token_net_kernel(%arg0: i32, %arg1: memref<18xi32, #tpu.memory_space<smem>>, %arg2: memref<64x128xf32, #tpu.memory_space<vmem>>, %arg3: memref<128x128xf32, #tpu.memory_space<vmem>>, %arg4: memref<128x384xf32, #tpu.memory_space<vmem>>, %arg5: memref<1x384xf32, #tpu.memory_space<vmem>>, %arg6: memref<128x256xf32, #tpu.memory_space<vmem>>, %arg7: memref<1x256xf32, #tpu.memory_space<vmem>>, %arg8: memref<128x256xf32, #tpu.memory_space<vmem>>, %arg9: memref<1x256xf32, #tpu.memory_space<vmem>>, %arg10: memref<128x256xf32, #tpu.memory_space<vmem>>, %arg11: memref<1x256xf32, #tpu.memory_space<vmem>>, %arg12: memref<2x128xf32, #tpu.memory_space<vmem>>, %arg13: memref<8x128xf32, #tpu.memory_space<vmem>>, %arg14: memref<40x128xf32, #tpu.memory_space<vmem>>, %arg15: memref<24x128xf32, #tpu.memory_space<vmem>>) attributes {dimension_semantics = [#tpu.dimension_semantics<arbitrary>], iteration_bounds = array<i64: 1>, scalar_prefetch = 1 : i64, scratch_operands = 3 : i64, tpu.core_type = #tpu.core_type<tc>, window_params = [{pipeline_mode = #tpu.pipeline_mode<synchronous>, transform_indices = @transform_0, window_bounds = array<i64: 64, 128>}, {pipeline_mode = #tpu.pipeline_mode<synchronous>, transform_indices = @transform_1, window_bounds = array<i64: 128, 128>}, {pipeline_mode = #tpu.pipeline_mode<synchronous>, transform_indices = @transform_2, window_bounds = array<i64: 128, 384>}, {pipeline_mode = #tpu.pipeline_mode<synchronous>, transform_indices = @transform_3, window_bounds = array<i64: 1, 384>}, {pipeline_mode = #tpu.pipeline_mode<synchronous>, transform_indices = @transform_4, window_bounds = array<i64: 128, 256>}, {pipeline_mode = #tpu.pipeline_mode<synchronous>, transform_indices = @transform_5, window_bounds = array<i64: 1, 256>}, {pipeline_mode = #tpu.pipeline_mode<synchronous>, transform_indices = @transform_6, window_bounds = array<i64: 128, 256>}, {pipeline_mode = #tpu.pipeline_mode<synchronous>, transform_indices = @transform_7, window_bounds = array<i64: 1, 256>}, {pipeline_mode = #tpu.pipeline_mode<synchronous>, transform_indices = @transform_8, window_bounds = array<i64: 128, 256>}, {pipeline_mode = #tpu.pipeline_mode<synchronous>, transform_indices = @transform_9, window_bounds = array<i64: 1, 256>}, {pipeline_mode = #tpu.pipeline_mode<synchronous>, transform_indices = @transform_10, window_bounds = array<i64: 2, 128>}]} {
    %cst = arith.constant 0.000000e+00 : f32
    %0 = vector.broadcast %cst : f32 to vector<8x128xf32>
    %c0 = arith.constant 0 : index
    %c0_0 = arith.constant 0 : index
    %1 = vector.load %arg13[%c0, %c0_0] : memref<8x128xf32, #tpu.memory_space<vmem>>, vector<8x128xf32>
    tpu.vector_store %arg13[%c0, %c0_0], %0 {strides = array<i32>} : memref<8x128xf32, #tpu.memory_space<vmem>>, vector<8x128xf32>,
    %cst_1 = arith.constant 0.000000e+00 : f32
    %2 = vector.broadcast %cst_1 : f32 to vector<40x128xf32>
    %c0_2 = arith.constant 0 : index
    %c0_3 = arith.constant 0 : index
    %3 = vector.load %arg14[%c0_2, %c0_3] : memref<40x128xf32, #tpu.memory_space<vmem>>, vector<40x128xf32>
    tpu.vector_store %arg14[%c0_2, %c0_3], %2 {strides = array<i32>} : memref<40x128xf32, #tpu.memory_space<vmem>>, vector<40x128xf32>,
    %cst_4 = arith.constant 0.000000e+00 : f32
    %4 = vector.broadcast %cst_4 : f32 to vector<24x128xf32>
    %c0_5 = arith.constant 0 : index
    %c0_6 = arith.constant 0 : index
    %5 = vector.load %arg15[%c0_5, %c0_6] : memref<24x128xf32, #tpu.memory_space<vmem>>, vector<24x128xf32>
    tpu.vector_store %arg15[%c0_5, %c0_6], %4 {strides = array<i32>} : memref<24x128xf32, #tpu.memory_space<vmem>>, vector<24x128xf32>,
    %c0_7 = arith.constant 0 : index
    %6 = memref.load %arg1[%c0_7] : memref<18xi32, #tpu.memory_space<smem>>
    %7 = arith.index_cast %6 : i32 to index
    %c0_8 = arith.constant 0 : index
    %8 = vector.load %arg2[%7, %c0_8] : memref<64x128xf32, #tpu.memory_space<vmem>>, vector<1x128xf32>
    %c0_9 = arith.constant 0 : index
    %c0_10 = arith.constant 0 : index
    %9 = vector.load %arg13[%c0_9, %c0_10] : memref<8x128xf32, #tpu.memory_space<vmem>>, vector<1x128xf32>
    tpu.vector_store %arg13[%c0_9, %c0_10], %8 {strides = array<i32>} : memref<8x128xf32, #tpu.memory_space<vmem>>, vector<1x128xf32>,
    %c1 = arith.constant 1 : index
    %10 = memref.load %arg1[%c1] : memref<18xi32, #tpu.memory_space<smem>>
    %11 = arith.index_cast %10 : i32 to index
    %c0_11 = arith.constant 0 : index
    %12 = vector.load %arg2[%11, %c0_11] : memref<64x128xf32, #tpu.memory_space<vmem>>, vector<1x128xf32>
    %c1_12 = arith.constant 1 : index
    %c0_13 = arith.constant 0 : index
    %13 = vector.load %arg13[%c1_12, %c0_13] : memref<8x128xf32, #tpu.memory_space<vmem>>, vector<1x128xf32>
    tpu.vector_store %arg13[%c1_12, %c0_13], %12 {strides = array<i32>} : memref<8x128xf32, #tpu.memory_space<vmem>>, vector<1x128xf32>,
    %c2 = arith.constant 2 : index
    %14 = memref.load %arg1[%c2] : memref<18xi32, #tpu.memory_space<smem>>
    %15 = arith.index_cast %14 : i32 to index
    %c0_14 = arith.constant 0 : index
    %16 = vector.load %arg2[%15, %c0_14] : memref<64x128xf32, #tpu.memory_space<vmem>>, vector<1x128xf32>
    %c0_15 = arith.constant 0 : index
    %c0_16 = arith.constant 0 : index
    %17 = vector.load %arg14[%c0_15, %c0_16] : memref<40x128xf32, #tpu.memory_space<vmem>>, vector<1x128xf32>
    tpu.vector_store %arg14[%c0_15, %c0_16], %16 {strides = array<i32>} : memref<40x128xf32, #tpu.memory_space<vmem>>, vector<1x128xf32>,
    %c3 = arith.constant 3 : index
    %18 = memref.load %arg1[%c3] : memref<18xi32, #tpu.memory_space<smem>>
    %19 = arith.index_cast %18 : i32 to index
    %c0_17 = arith.constant 0 : index
    %20 = vector.load %arg2[%19, %c0_17] : memref<64x128xf32, #tpu.memory_space<vmem>>, vector<1x128xf32>
    %c1_18 = arith.constant 1 : index
    %c0_19 = arith.constant 0 : index
    %21 = vector.load %arg14[%c1_18, %c0_19] : memref<40x128xf32, #tpu.memory_space<vmem>>, vector<1x128xf32>
    tpu.vector_store %arg14[%c1_18, %c0_19], %20 {strides = array<i32>} : memref<40x128xf32, #tpu.memory_space<vmem>>, vector<1x128xf32>,
    %c4 = arith.constant 4 : index
    %22 = memref.load %arg1[%c4] : memref<18xi32, #tpu.memory_space<smem>>
    %23 = arith.index_cast %22 : i32 to index
    %c0_20 = arith.constant 0 : index
    %24 = vector.load %arg2[%23, %c0_20] : memref<64x128xf32, #tpu.memory_space<vmem>>, vector<1x128xf32>
    %c8 = arith.constant 8 : index
    %c0_21 = arith.constant 0 : index
    %25 = vector.load %arg14[%c8, %c0_21] : memref<40x128xf32, #tpu.memory_space<vmem>>, vector<1x128xf32>
    tpu.vector_store %arg14[%c8, %c0_21], %24 {strides = array<i32>} : memref<40x128xf32, #tpu.memory_space<vmem>>, vector<1x128xf32>,
    %c5 = arith.constant 5 : index
    %26 = memref.load %arg1[%c5] : memref<18xi32, #tpu.memory_space<smem>>
    %27 = arith.index_cast %26 : i32 to index
    %c0_22 = arith.constant 0 : index
    %28 = vector.load %arg2[%27, %c0_22] : memref<64x128xf32, #tpu.memory_space<vmem>>, vector<1x128xf32>
    %c9 = arith.constant 9 : index
    %c0_23 = arith.constant 0 : index
    %29 = vector.load %arg14[%c9, %c0_23] : memref<40x128xf32, #tpu.memory_space<vmem>>, vector<1x128xf32>
    tpu.vector_store %arg14[%c9, %c0_23], %28 {strides = array<i32>} : memref<40x128xf32, #tpu.memory_space<vmem>>, vector<1x128xf32>,
    %c6 = arith.constant 6 : index
    %30 = memref.load %arg1[%c6] : memref<18xi32, #tpu.memory_space<smem>>
    %31 = arith.index_cast %30 : i32 to index
    %c0_24 = arith.constant 0 : index
    %32 = vector.load %arg2[%31, %c0_24] : memref<64x128xf32, #tpu.memory_space<vmem>>, vector<1x128xf32>
    %c16 = arith.constant 16 : index
    %c0_25 = arith.constant 0 : index
    %33 = vector.load %arg14[%c16, %c0_25] : memref<40x128xf32, #tpu.memory_space<vmem>>, vector<1x128xf32>
    tpu.vector_store %arg14[%c16, %c0_25], %32 {strides = array<i32>} : memref<40x128xf32, #tpu.memory_space<vmem>>, vector<1x128xf32>,
    %c7 = arith.constant 7 : index
    %34 = memref.load %arg1[%c7] : memref<18xi32, #tpu.memory_space<smem>>
    %35 = arith.index_cast %34 : i32 to index
    %c0_26 = arith.constant 0 : index
    %36 = vector.load %arg2[%35, %c0_26] : memref<64x128xf32, #tpu.memory_space<vmem>>, vector<1x128xf32>
    %c17 = arith.constant 17 : index
    %c0_27 = arith.constant 0 : index
    %37 = vector.load %arg14[%c17, %c0_27] : memref<40x128xf32, #tpu.memory_space<vmem>>, vector<1x128xf32>
    tpu.vector_store %arg14[%c17, %c0_27], %36 {strides = array<i32>} : memref<40x128xf32, #tpu.memory_space<vmem>>, vector<1x128xf32>,
    %c8_28 = arith.constant 8 : index
    %38 = memref.load %arg1[%c8_28] : memref<18xi32, #tpu.memory_space<smem>>
    %39 = arith.index_cast %38 : i32 to index
    %c0_29 = arith.constant 0 : index
    %40 = vector.load %arg2[%39, %c0_29] : memref<64x128xf32, #tpu.memory_space<vmem>>, vector<1x128xf32>
    %c24 = arith.constant 24 : index
    %c0_30 = arith.constant 0 : index
    %41 = vector.load %arg14[%c24, %c0_30] : memref<40x128xf32, #tpu.memory_space<vmem>>, vector<1x128xf32>
    tpu.vector_store %arg14[%c24, %c0_30], %40 {strides = array<i32>} : memref<40x128xf32, #tpu.memory_space<vmem>>, vector<1x128xf32>,
    %c9_31 = arith.constant 9 : index
    %42 = memref.load %arg1[%c9_31] : memref<18xi32, #tpu.memory_space<smem>>
    %43 = arith.index_cast %42 : i32 to index
    %c0_32 = arith.constant 0 : index
    %44 = vector.load %arg2[%43, %c0_32] : memref<64x128xf32, #tpu.memory_space<vmem>>, vector<1x128xf32>
    %c25 = arith.constant 25 : index
    %c0_33 = arith.constant 0 : index
    %45 = vector.load %arg14[%c25, %c0_33] : memref<40x128xf32, #tpu.memory_space<vmem>>, vector<1x128xf32>
    tpu.vector_store %arg14[%c25, %c0_33], %44 {strides = array<i32>} : memref<40x128xf32, #tpu.memory_space<vmem>>, vector<1x128xf32>,
    %c10 = arith.constant 10 : index
    %46 = memref.load %arg1[%c10] : memref<18xi32, #tpu.memory_space<smem>>
    %47 = arith.index_cast %46 : i32 to index
    %c0_34 = arith.constant 0 : index
    %48 = vector.load %arg2[%47, %c0_34] : memref<64x128xf32, #tpu.memory_space<vmem>>, vector<1x128xf32>
    %c32 = arith.constant 32 : index
    %c0_35 = arith.constant 0 : index
    %49 = vector.load %arg14[%c32, %c0_35] : memref<40x128xf32, #tpu.memory_space<vmem>>, vector<1x128xf32>
    tpu.vector_store %arg14[%c32, %c0_35], %48 {strides = array<i32>} : memref<40x128xf32, #tpu.memory_space<vmem>>, vector<1x128xf32>,
    %c11 = arith.constant 11 : index
    %50 = memref.load %arg1[%c11] : memref<18xi32, #tpu.memory_space<smem>>
    %51 = arith.index_cast %50 : i32 to index
    %c0_36 = arith.constant 0 : index
    %52 = vector.load %arg2[%51, %c0_36] : memref<64x128xf32, #tpu.memory_space<vmem>>, vector<1x128xf32>
    %c33 = arith.constant 33 : index
    %c0_37 = arith.constant 0 : index
    %53 = vector.load %arg14[%c33, %c0_37] : memref<40x128xf32, #tpu.memory_space<vmem>>, vector<1x128xf32>
    tpu.vector_store %arg14[%c33, %c0_37], %52 {strides = array<i32>} : memref<40x128xf32, #tpu.memory_space<vmem>>, vector<1x128xf32>,
    %c12 = arith.constant 12 : index
    %54 = memref.load %arg1[%c12] : memref<18xi32, #tpu.memory_space<smem>>
    %55 = arith.index_cast %54 : i32 to index
    %c0_38 = arith.constant 0 : index
    %56 = vector.load %arg2[%55, %c0_38] : memref<64x128xf32, #tpu.memory_space<vmem>>, vector<1x128xf32>
    %c0_39 = arith.constant 0 : index
    %c0_40 = arith.constant 0 : index
    %57 = vector.load %arg15[%c0_39, %c0_40] : memref<24x128xf32, #tpu.memory_space<vmem>>, vector<1x128xf32>
    tpu.vector_store %arg15[%c0_39, %c0_40], %56 {strides = array<i32>} : memref<24x128xf32, #tpu.memory_space<vmem>>, vector<1x128xf32>,
    %c13 = arith.constant 13 : index
    %58 = memref.load %arg1[%c13] : memref<18xi32, #tpu.memory_space<smem>>
    %59 = arith.index_cast %58 : i32 to index
    %c0_41 = arith.constant 0 : index
    %60 = vector.load %arg2[%59, %c0_41] : memref<64x128xf32, #tpu.memory_space<vmem>>, vector<1x128xf32>
    %c1_42 = arith.constant 1 : index
    %c0_43 = arith.constant 0 : index
    %61 = vector.load %arg15[%c1_42, %c0_43] : memref<24x128xf32, #tpu.memory_space<vmem>>, vector<1x128xf32>
    tpu.vector_store %arg15[%c1_42, %c0_43], %60 {strides = array<i32>} : memref<24x128xf32, #tpu.memory_space<vmem>>, vector<1x128xf32>,
    %c14 = arith.constant 14 : index
    %62 = memref.load %arg1[%c14] : memref<18xi32, #tpu.memory_space<smem>>
    %63 = arith.index_cast %62 : i32 to index
    %c0_44 = arith.constant 0 : index
    %64 = vector.load %arg2[%63, %c0_44] : memref<64x128xf32, #tpu.memory_space<vmem>>, vector<1x128xf32>
    %c8_45 = arith.constant 8 : index
    %c0_46 = arith.constant 0 : index
    %65 = vector.load %arg15[%c8_45, %c0_46] : memref<24x128xf32, #tpu.memory_space<vmem>>, vector<1x128xf32>
    tpu.vector_store %arg15[%c8_45, %c0_46], %64 {strides = array<i32>} : memref<24x128xf32, #tpu.memory_space<vmem>>, vector<1x128xf32>,
    %c15 = arith.constant 15 : index
    %66 = memref.load %arg1[%c15] : memref<18xi32, #tpu.memory_space<smem>>
    %67 = arith.index_cast %66 : i32 to index
    %c0_47 = arith.constant 0 : index
    %68 = vector.load %arg2[%67, %c0_47] : memref<64x128xf32, #tpu.memory_space<vmem>>, vector<1x128xf32>
    %c9_48 = arith.constant 9 : index
    %c0_49 = arith.constant 0 : index
    %69 = vector.load %arg15[%c9_48, %c0_49] : memref<24x128xf32, #tpu.memory_space<vmem>>, vector<1x128xf32>
    tpu.vector_store %arg15[%c9_48, %c0_49], %68 {strides = array<i32>} : memref<24x128xf32, #tpu.memory_space<vmem>>, vector<1x128xf32>,
    %c16_50 = arith.constant 16 : index
    %70 = memref.load %arg1[%c16_50] : memref<18xi32, #tpu.memory_space<smem>>
    %71 = arith.index_cast %70 : i32 to index
    %c0_51 = arith.constant 0 : index
    %72 = vector.load %arg2[%71, %c0_51] : memref<64x128xf32, #tpu.memory_space<vmem>>, vector<1x128xf32>
    %c16_52 = arith.constant 16 : index
    %c0_53 = arith.constant 0 : index
    %73 = vector.load %arg15[%c16_52, %c0_53] : memref<24x128xf32, #tpu.memory_space<vmem>>, vector<1x128xf32>
    tpu.vector_store %arg15[%c16_52, %c0_53], %72 {strides = array<i32>} : memref<24x128xf32, #tpu.memory_space<vmem>>, vector<1x128xf32>,
    %c17_54 = arith.constant 17 : index
    %74 = memref.load %arg1[%c17_54] : memref<18xi32, #tpu.memory_space<smem>>
    %75 = arith.index_cast %74 : i32 to index
    %c0_55 = arith.constant 0 : index
    %76 = vector.load %arg2[%75, %c0_55] : memref<64x128xf32, #tpu.memory_space<vmem>>, vector<1x128xf32>
    %c17_56 = arith.constant 17 : index
    %c0_57 = arith.constant 0 : index
    %77 = vector.load %arg15[%c17_56, %c0_57] : memref<24x128xf32, #tpu.memory_space<vmem>>, vector<1x128xf32>
    tpu.vector_store %arg15[%c17_56, %c0_57], %76 {strides = array<i32>} : memref<24x128xf32, #tpu.memory_space<vmem>>, vector<1x128xf32>,
    %c0_58 = arith.constant 0 : index
    %c0_59 = arith.constant 0 : index
    %78 = vector.load %arg13[%c0_58, %c0_59] : memref<8x128xf32, #tpu.memory_space<vmem>>, vector<8x128xf32>
    %c0_60 = arith.constant 0 : index
    %c0_61 = arith.constant 0 : index
    %79 = vector.load %arg3[%c0_60, %c0_61] : memref<128x128xf32, #tpu.memory_space<vmem>>, vector<128x128xf32>
    %c0_62 = arith.constant 0 : index
    %c0_63 = arith.constant 0 : index
    %80 = vector.load %arg4[%c0_62, %c0_63] : memref<128x384xf32, #tpu.memory_space<vmem>>, vector<128x384xf32>
    %cst_64 = arith.constant dense<0.000000e+00> : vector<8x384xf32>
    %81 = tpu.matmul %78, %80, %cst_64 {dimension_numbers = #tpu.dot_dimension_numbers<[1], [0], [0], [1], [0, 0, 1, 1], [], []>} : vector<8x128xf32>, vector<128x384xf32>, vector<8x384xf32> -> vector<8x384xf32>
    %c0_65 = arith.constant 0 : index
    %c0_66 = arith.constant 0 : index
    %82 = vector.load %arg5[%c0_65, %c0_66] : memref<1x384xf32, #tpu.memory_space<vmem>>, vector<1x384xf32>
    %83 = vector.broadcast %82 : vector<1x384xf32> to vector<8x384xf32>
    %84 = arith.addf %81, %83 : vector<8x384xf32>
    %85 = vector.extract_strided_slice %84 {offsets = [0, 0], sizes = [8, 128], strides = [1, 1]} : vector<8x384xf32> to vector<8x128xf32>
    %86 = vector.extract_strided_slice %84 {offsets = [0, 128], sizes = [8, 128], strides = [1, 1]} : vector<8x384xf32> to vector<8x128xf32>
    %87 = vector.extract_strided_slice %84 {offsets = [0, 256], sizes = [8, 128], strides = [1, 1]} : vector<8x384xf32> to vector<8x128xf32>
    %c0_67 = arith.constant 0 : index
    %c0_68 = arith.constant 0 : index
    %88 = vector.load %arg14[%c0_67, %c0_68] : memref<40x128xf32, #tpu.memory_space<vmem>>, vector<40x128xf32>
    %c0_69 = arith.constant 0 : index
    %c0_70 = arith.constant 0 : index
    %89 = vector.load %arg6[%c0_69, %c0_70] : memref<128x256xf32, #tpu.memory_space<vmem>>, vector<128x256xf32>
    %cst_71 = arith.constant dense<0.000000e+00> : vector<40x256xf32>
    %90 = tpu.matmul %88, %89, %cst_71 {dimension_numbers = #tpu.dot_dimension_numbers<[1], [0], [0], [1], [0, 0, 1, 1], [], []>} : vector<40x128xf32>, vector<128x256xf32>, vector<40x256xf32> -> vector<40x256xf32>
    %c0_72 = arith.constant 0 : index
    %c0_73 = arith.constant 0 : index
    %91 = vector.load %arg7[%c0_72, %c0_73] : memref<1x256xf32, #tpu.memory_space<vmem>>, vector<1x256xf32>
    %92 = vector.broadcast %91 : vector<1x256xf32> to vector<40x256xf32>
    %93 = arith.addf %90, %92 : vector<40x256xf32>
    %94 = vector.extract_strided_slice %93 {offsets = [0, 0], sizes = [40, 128], strides = [1, 1]} : vector<40x256xf32> to vector<40x128xf32>
    %95 = tpu.concatenate %85, %85, %85, %85, %85 in 0 : vector<8x128xf32>, vector<8x128xf32>, vector<8x128xf32>, vector<8x128xf32>, vector<8x128xf32> -> vector<40x128xf32>
    %96 = arith.mulf %95, %94 : vector<40x128xf32>
    %cst_74 = arith.constant dense<0.000000e+00> : vector<40x128xf32>
    %97 = tpu.matmul %96, %79, %cst_74 {dimension_numbers = #tpu.dot_dimension_numbers<[1], [0], [0], [1], [0, 0, 1, 1], [], []>} : vector<40x128xf32>, vector<128x128xf32>, vector<40x128xf32> -> vector<40x128xf32>
    %98 = vector.extract_strided_slice %97 {offsets = [0, 0], sizes = [8, 128], strides = [1, 1]} : vector<40x128xf32> to vector<8x128xf32>
    %99 = vector.extract_strided_slice %97 {offsets = [8, 0], sizes = [8, 128], strides = [1, 1]} : vector<40x128xf32> to vector<8x128xf32>
    %100 = vector.extract_strided_slice %97 {offsets = [16, 0], sizes = [8, 128], strides = [1, 1]} : vector<40x128xf32> to vector<8x128xf32>
    %101 = vector.extract_strided_slice %97 {offsets = [24, 0], sizes = [8, 128], strides = [1, 1]} : vector<40x128xf32> to vector<8x128xf32>
    %102 = vector.extract_strided_slice %97 {offsets = [32, 0], sizes = [8, 128], strides = [1, 1]} : vector<40x128xf32> to vector<8x128xf32>
    %103 = arith.maximumf %98, %99 : vector<8x128xf32>
    %104 = arith.maximumf %103, %100 : vector<8x128xf32>
    %105 = arith.maximumf %104, %101 : vector<8x128xf32>
    %106 = arith.maximumf %105, %102 : vector<8x128xf32>
    %107 = arith.subf %98, %106 : vector<8x128xf32>
    %108 = math.exp %107 : vector<8x128xf32>
    %109 = arith.subf %99, %106 : vector<8x128xf32>
    %110 = math.exp %109 : vector<8x128xf32>
    %111 = arith.subf %100, %106 : vector<8x128xf32>
    %112 = math.exp %111 : vector<8x128xf32>
    %113 = arith.subf %101, %106 : vector<8x128xf32>
    %114 = math.exp %113 : vector<8x128xf32>
    %115 = arith.subf %102, %106 : vector<8x128xf32>
    %116 = math.exp %115 : vector<8x128xf32>
    %117 = arith.addf %108, %110 : vector<8x128xf32>
    %118 = arith.addf %117, %112 : vector<8x128xf32>
    %119 = arith.addf %118, %114 : vector<8x128xf32>
    %120 = arith.addf %119, %116 : vector<8x128xf32>
    %121 = tpu.reciprocal %120 : vector<8x128xf32> -> vector<8x128xf32>
    %cst_75 = arith.constant 0.000000e+00 : f32
    %122 = vector.broadcast %cst_75 : f32 to vector<8x128xf32>
    %123 = arith.mulf %108, %121 : vector<8x128xf32>
    %124 = vector.extract_strided_slice %93 {offsets = [0, 128], sizes = [8, 128], strides = [1, 1]} : vector<40x256xf32> to vector<8x128xf32>
    %125 = arith.mulf %123, %124 : vector<8x128xf32>
    %126 = arith.addf %122, %125 : vector<8x128xf32>
    %127 = arith.mulf %110, %121 : vector<8x128xf32>
    %128 = vector.extract_strided_slice %93 {offsets = [8, 128], sizes = [8, 128], strides = [1, 1]} : vector<40x256xf32> to vector<8x128xf32>
    %129 = arith.mulf %127, %128 : vector<8x128xf32>
    %130 = arith.addf %126, %129 : vector<8x128xf32>
    %131 = arith.mulf %112, %121 : vector<8x128xf32>
    %132 = vector.extract_strided_slice %93 {offsets = [16, 128], sizes = [8, 128], strides = [1, 1]} : vector<40x256xf32> to vector<8x128xf32>
    %133 = arith.mulf %131, %132 : vector<8x128xf32>
    %134 = arith.addf %130, %133 : vector<8x128xf32>
    %135 = arith.mulf %114, %121 : vector<8x128xf32>
    %136 = vector.extract_strided_slice %93 {offsets = [24, 128], sizes = [8, 128], strides = [1, 1]} : vector<40x256xf32> to vector<8x128xf32>
    %137 = arith.mulf %135, %136 : vector<8x128xf32>
    %138 = arith.addf %134, %137 : vector<8x128xf32>
    %139 = arith.mulf %116, %121 : vector<8x128xf32>
    %140 = vector.extract_strided_slice %93 {offsets = [32, 128], sizes = [8, 128], strides = [1, 1]} : vector<40x256xf32> to vector<8x128xf32>
    %141 = arith.mulf %139, %140 : vector<8x128xf32>
    %142 = arith.addf %138, %141 : vector<8x128xf32>
    %c0_76 = arith.constant 0 : index
    %c0_77 = arith.constant 0 : index
    %143 = vector.load %arg15[%c0_76, %c0_77] : memref<24x128xf32, #tpu.memory_space<vmem>>, vector<24x128xf32>
    %c0_78 = arith.constant 0 : index
    %c0_79 = arith.constant 0 : index
    %144 = vector.load %arg8[%c0_78, %c0_79] : memref<128x256xf32, #tpu.memory_space<vmem>>, vector<128x256xf32>
    %cst_80 = arith.constant dense<0.000000e+00> : vector<24x256xf32>
    %145 = tpu.matmul %143, %144, %cst_80 {dimension_numbers = #tpu.dot_dimension_numbers<[1], [0], [0], [1], [0, 0, 1, 1], [], []>} : vector<24x128xf32>, vector<128x256xf32>, vector<24x256xf32> -> vector<24x256xf32>
    %c0_81 = arith.constant 0 : index
    %c0_82 = arith.constant 0 : index
    %146 = vector.load %arg9[%c0_81, %c0_82] : memref<1x256xf32, #tpu.memory_space<vmem>>, vector<1x256xf32>
    %147 = vector.broadcast %146 : vector<1x256xf32> to vector<24x256xf32>
    %148 = arith.addf %145, %147 : vector<24x256xf32>
    %149 = vector.extract_strided_slice %148 {offsets = [0, 0], sizes = [24, 128], strides = [1, 1]} : vector<24x256xf32> to vector<24x128xf32>
    %150 = tpu.concatenate %86, %86, %86 in 0 : vector<8x128xf32>, vector<8x128xf32>, vector<8x128xf32> -> vector<24x128xf32>
    %151 = arith.mulf %150, %149 : vector<24x128xf32>
    %cst_83 = arith.constant dense<0.000000e+00> : vector<24x128xf32>
    %152 = tpu.matmul %151, %79, %cst_83 {dimension_numbers = #tpu.dot_dimension_numbers<[1], [0], [0], [1], [0, 0, 1, 1], [], []>} : vector<24x128xf32>, vector<128x128xf32>, vector<24x128xf32> -> vector<24x128xf32>
    %153 = vector.extract_strided_slice %152 {offsets = [0, 0], sizes = [8, 128], strides = [1, 1]} : vector<24x128xf32> to vector<8x128xf32>
    %154 = vector.extract_strided_slice %152 {offsets = [8, 0], sizes = [8, 128], strides = [1, 1]} : vector<24x128xf32> to vector<8x128xf32>
    %155 = vector.extract_strided_slice %152 {offsets = [16, 0], sizes = [8, 128], strides = [1, 1]} : vector<24x128xf32> to vector<8x128xf32>
    %156 = arith.maximumf %153, %154 : vector<8x128xf32>
    %157 = arith.maximumf %156, %155 : vector<8x128xf32>
    %158 = arith.subf %153, %157 : vector<8x128xf32>
    %159 = math.exp %158 : vector<8x128xf32>
    %160 = arith.subf %154, %157 : vector<8x128xf32>
    %161 = math.exp %160 : vector<8x128xf32>
    %162 = arith.subf %155, %157 : vector<8x128xf32>
    %163 = math.exp %162 : vector<8x128xf32>
    %164 = arith.addf %159, %161 : vector<8x128xf32>
    %165 = arith.addf %164, %163 : vector<8x128xf32>
    %166 = tpu.reciprocal %165 : vector<8x128xf32> -> vector<8x128xf32>
    %cst_84 = arith.constant 0.000000e+00 : f32
    %167 = vector.broadcast %cst_84 : f32 to vector<8x128xf32>
    %168 = arith.mulf %159, %166 : vector<8x128xf32>
    %169 = vector.extract_strided_slice %148 {offsets = [0, 128], sizes = [8, 128], strides = [1, 1]} : vector<24x256xf32> to vector<8x128xf32>
    %170 = arith.mulf %168, %169 : vector<8x128xf32>
    %171 = arith.addf %167, %170 : vector<8x128xf32>
    %172 = arith.mulf %161, %166 : vector<8x128xf32>
    %173 = vector.extract_strided_slice %148 {offsets = [8, 128], sizes = [8, 128], strides = [1, 1]} : vector<24x256xf32> to vector<8x128xf32>
    %174 = arith.mulf %172, %173 : vector<8x128xf32>
    %175 = arith.addf %171, %174 : vector<8x128xf32>
    %176 = arith.mulf %163, %166 : vector<8x128xf32>
    %177 = vector.extract_strided_slice %148 {offsets = [16, 128], sizes = [8, 128], strides = [1, 1]} : vector<24x256xf32> to vector<8x128xf32>
    %178 = arith.mulf %176, %177 : vector<8x128xf32>
    %179 = arith.addf %175, %178 : vector<8x128xf32>
    %180 = tpu.concatenate %142, %78, %179 in 0 : vector<8x128xf32>, vector<8x128xf32>, vector<8x128xf32> -> vector<24x128xf32>
    %c0_85 = arith.constant 0 : index
    %c0_86 = arith.constant 0 : index
    %181 = vector.load %arg10[%c0_85, %c0_86] : memref<128x256xf32, #tpu.memory_space<vmem>>, vector<128x256xf32>
    %cst_87 = arith.constant dense<0.000000e+00> : vector<24x256xf32>
    %182 = tpu.matmul %180, %181, %cst_87 {dimension_numbers = #tpu.dot_dimension_numbers<[1], [0], [0], [1], [0, 0, 1, 1], [], []>} : vector<24x128xf32>, vector<128x256xf32>, vector<24x256xf32> -> vector<24x256xf32>
    %c0_88 = arith.constant 0 : index
    %c0_89 = arith.constant 0 : index
    %183 = vector.load %arg11[%c0_88, %c0_89] : memref<1x256xf32, #tpu.memory_space<vmem>>, vector<1x256xf32>
    %184 = vector.broadcast %183 : vector<1x256xf32> to vector<24x256xf32>
    %185 = arith.addf %182, %184 : vector<24x256xf32>
    %186 = vector.extract_strided_slice %185 {offsets = [0, 0], sizes = [24, 128], strides = [1, 1]} : vector<24x256xf32> to vector<24x128xf32>
    %187 = tpu.concatenate %87, %87, %87 in 0 : vector<8x128xf32>, vector<8x128xf32>, vector<8x128xf32> -> vector<24x128xf32>
    %188 = arith.mulf %187, %186 : vector<24x128xf32>
    %cst_90 = arith.constant dense<0.000000e+00> : vector<24x128xf32>
    %189 = tpu.matmul %188, %79, %cst_90 {dimension_numbers = #tpu.dot_dimension_numbers<[1], [0], [0], [1], [0, 0, 1, 1], [], []>} : vector<24x128xf32>, vector<128x128xf32>, vector<24x128xf32> -> vector<24x128xf32>
    %190 = vector.extract_strided_slice %189 {offsets = [0, 0], sizes = [8, 128], strides = [1, 1]} : vector<24x128xf32> to vector<8x128xf32>
    %191 = vector.extract_strided_slice %189 {offsets = [8, 0], sizes = [8, 128], strides = [1, 1]} : vector<24x128xf32> to vector<8x128xf32>
    %192 = vector.extract_strided_slice %189 {offsets = [16, 0], sizes = [8, 128], strides = [1, 1]} : vector<24x128xf32> to vector<8x128xf32>
    %193 = arith.maximumf %190, %191 : vector<8x128xf32>
    %194 = arith.maximumf %193, %192 : vector<8x128xf32>
    %195 = arith.subf %190, %194 : vector<8x128xf32>
    %196 = math.exp %195 : vector<8x128xf32>
    %197 = arith.subf %191, %194 : vector<8x128xf32>
    %198 = math.exp %197 : vector<8x128xf32>
    %199 = arith.subf %192, %194 : vector<8x128xf32>
    %200 = math.exp %199 : vector<8x128xf32>
    %201 = arith.addf %196, %198 : vector<8x128xf32>
    %202 = arith.addf %201, %200 : vector<8x128xf32>
    %203 = tpu.reciprocal %202 : vector<8x128xf32> -> vector<8x128xf32>
    %cst_91 = arith.constant 0.000000e+00 : f32
    %204 = vector.broadcast %cst_91 : f32 to vector<8x128xf32>
    %205 = arith.mulf %196, %203 : vector<8x128xf32>
    %206 = vector.extract_strided_slice %185 {offsets = [0, 128], sizes = [8, 128], strides = [1, 1]} : vector<24x256xf32> to vector<8x128xf32>
    %207 = arith.mulf %205, %206 : vector<8x128xf32>
    %208 = arith.addf %204, %207 : vector<8x128xf32>
    %209 = arith.mulf %198, %203 : vector<8x128xf32>
    %210 = vector.extract_strided_slice %185 {offsets = [8, 128], sizes = [8, 128], strides = [1, 1]} : vector<24x256xf32> to vector<8x128xf32>
    %211 = arith.mulf %209, %210 : vector<8x128xf32>
    %212 = arith.addf %208, %211 : vector<8x128xf32>
    %213 = arith.mulf %200, %203 : vector<8x128xf32>
    %214 = vector.extract_strided_slice %185 {offsets = [16, 128], sizes = [8, 128], strides = [1, 1]} : vector<24x256xf32> to vector<8x128xf32>
    %215 = arith.mulf %213, %214 : vector<8x128xf32>
    %216 = arith.addf %212, %215 : vector<8x128xf32>
    %217 = vector.extract_strided_slice %216 {offsets = [0, 0], sizes = [2, 128], strides = [1, 1]} : vector<8x128xf32> to vector<2x128xf32>
    %c0_92 = arith.constant 0 : index
    %c0_93 = arith.constant 0 : index
    %218 = vector.load %arg12[%c0_92, %c0_93] : memref<2x128xf32, #tpu.memory_space<vmem>>, vector<2x128xf32>
    tpu.vector_store %arg12[%c0_92, %c0_93], %217 {strides = array<i32>} : memref<2x128xf32, #tpu.memory_space<vmem>>, vector<2x128xf32>,
    return
  }
  func.func @transform_0(%arg0: i32, %arg1: memref<18xi32, #tpu.memory_space<smem>>) -> (i32, i32) {
    %c0_i32 = arith.constant 0 : i32
    %c0_i32_0 = arith.constant 0 : i32
    %c0_i32_1 = arith.constant 0 : i32
    return %c0_i32, %c0_i32_0 : i32, i32
  }
  func.func @transform_1(%arg0: i32, %arg1: memref<18xi32, #tpu.memory_space<smem>>) -> (i32, i32) {
    %c0_i32 = arith.constant 0 : i32
    %c0_i32_0 = arith.constant 0 : i32
    %c0_i32_1 = arith.constant 0 : i32
    return %c0_i32, %c0_i32_0 : i32, i32
  }
  func.func @transform_2(%arg0: i32, %arg1: memref<18xi32, #tpu.memory_space<smem>>) -> (i32, i32) {
    %c0_i32 = arith.constant 0 : i32
    %c0_i32_0 = arith.constant 0 : i32
    %c0_i32_1 = arith.constant 0 : i32
    return %c0_i32, %c0_i32_0 : i32, i32
  }
  func.func @transform_3(%arg0: i32, %arg1: memref<18xi32, #tpu.memory_space<smem>>) -> (i32, i32) {
    %c0_i32 = arith.constant 0 : i32
    %c0_i32_0 = arith.constant 0 : i32
    %c0_i32_1 = arith.constant 0 : i32
    return %c0_i32, %c0_i32_0 : i32, i32
  }
  func.func @transform_4(%arg0: i32, %arg1: memref<18xi32, #tpu.memory_space<smem>>) -> (i32, i32) {
    %c0_i32 = arith.constant 0 : i32
    %c0_i32_0 = arith.constant 0 : i32
    %c0_i32_1 = arith.constant 0 : i32
    return %c0_i32, %c0_i32_0 : i32, i32
  }
  func.func @transform_5(%arg0: i32, %arg1: memref<18xi32, #tpu.memory_space<smem>>) -> (i32, i32) {
    %c0_i32 = arith.constant 0 : i32
    %c0_i32_0 = arith.constant 0 : i32
    %c0_i32_1 = arith.constant 0 : i32
    return %c0_i32, %c0_i32_0 : i32, i32
  }
  func.func @transform_6(%arg0: i32, %arg1: memref<18xi32, #tpu.memory_space<smem>>) -> (i32, i32) {
    %c0_i32 = arith.constant 0 : i32
    %c0_i32_0 = arith.constant 0 : i32
    %c0_i32_1 = arith.constant 0 : i32
    return %c0_i32, %c0_i32_0 : i32, i32
  }
  func.func @transform_7(%arg0: i32, %arg1: memref<18xi32, #tpu.memory_space<smem>>) -> (i32, i32) {
    %c0_i32 = arith.constant 0 : i32
    %c0_i32_0 = arith.constant 0 : i32
    %c0_i32_1 = arith.constant 0 : i32
    return %c0_i32, %c0_i32_0 : i32, i32
  }
  func.func @transform_8(%arg0: i32, %arg1: memref<18xi32, #tpu.memory_space<smem>>) -> (i32, i32) {
    %c0_i32 = arith.constant 0 : i32
    %c0_i32_0 = arith.constant 0 : i32
    %c0_i32_1 = arith.constant 0 : i32
    return %c0_i32, %c0_i32_0 : i32, i32
  }
  func.func @transform_9(%arg0: i32, %arg1: memref<18xi32, #tpu.memory_space<smem>>) -> (i32, i32) {
    %c0_i32 = arith.constant 0 : i32
    %c0_i32_0 = arith.constant 0 : i32
    %c0_i32_1 = arith.constant 0 : i32
    return %c0_i32, %c0_i32_0 : i32, i32
  }
  func.func @transform_10(%arg0: i32, %arg1: memref<18xi32, #tpu.memory_space<smem>>) -> (i32, i32) {
    %c0_i32 = arith.constant 0 : i32
    %c0_i32_0 = arith.constant 0 : i32
    %c0_i32_1 = arith.constant 0 : i32
    return %c0_i32, %c0_i32_0 : i32, i32
  }
}

</mosaic_0001>

<bundles_post_ra>
// kernel: tpu_custom_call.1
= control target key start
LH: loop header
LB: loop body
LE: loop exit
PB: predicated region body
PF: predicated region fallthrough
CT: control target
= control target key end

     0   :  { %s1673_s17 = smov [#allocation6]   ;;  %s2092_s0 = inlined_call_operand.hbm [shape: s32[18], index: 0, kind: input, shape index: {}]   ;;  %s2093_s1 = inlined_call_operand.hbm [shape: f32[64,128], index: 1, kind: input, shape index: {}]   ;;  %s2094_s2 = inlined_call_operand.hbm [shape: f32[128,128], index: 2, kind: input, shape index: {}]   ;;  %s2095_s3 = inlined_call_operand.hbm [shape: f32[128,384], index: 3, kind: input, shape index: {}]   ;;  %s2096_s4 = inlined_call_operand.vmem [shape: f32[1,384], index: 4, kind: input, shape index: {}]   ;;  %s2097_s5 = inlined_call_operand.hbm [shape: f32[128,256], index: 5, kind: input, shape index: {}]   ;;  %s2098_s6 = inlined_call_operand.vmem [shape: f32[1,256], index: 6, kind: input, shape index: {}]   ;;  %s2099_s7 = inlined_call_operand.hbm [shape: f32[128,256], index: 7, kind: input, shape index: {}]   ;;  %s2100_s8 = inlined_call_operand.vmem [shape: f32[1,256], index: 8, kind: input, shape index: {}]   ;;  %s2101_s9 = inlined_call_operand.hbm [shape: f32[128,256], index: 9, kind: input, shape index: {}]   ;;  %s2102_s10 = inlined_call_operand.vmem [shape: f32[1,256], index: 10, kind: input, shape index: {}]   ;;  %s2103_s11 = inlined_call_operand.hbm [shape: f32[2,128], index: 11, kind: output, shape index: {}]  }
   0x1   :  { %17 = dma.hbm_to_smem %s2092_s0, 16, %s1673_s17, [#allocation5] }
   0x2   :  { %1661 = dma.done.wait [#allocation5], 16 }
   0x3   :  { %1662 = vsyncadd [#allocation5], 4294967280 }
   0x4   :  { %19 = sfence }
   0x5   :  { %20 = vsyncpa [#allocation8], 0 }
   0x6   :  { %21 = vsyncpa [#allocation11], 0 }
   0x7   :  { %22 = vsyncpa [#allocation14], 0 }
   0x8   :  { %23 = vsyncpa [#allocation17], 0 }
   0x9   :  { %24 = vsyncpa [#allocation9], 0  ;;  %s1674_s20 = smov [#allocation10]   ;;  %s1675_s22 = smov [#allocation13]  }
   0xa   :  { %s42_s21 = sshll.u32 %s1674_s20, 4  ;;  %s68_s23 = sshll.u32 %s1675_s22, 4  ;;  %s43_s21 = int_to_ptr.vmem [resolvable:$true] %s42_s21  ;;  %s69_s23 = int_to_ptr.vmem [resolvable:$true] %s68_s23 }
   0xb   :  { %s1529_s24 = scalar_lea.vmem %s43_s21, 2048  ;;  %p1534_p1 = scmp.lt.s32.totalorder %s43_s21, %s43_s21 }
   0xc   :  { %p1530_p0 = scmp.ne.s32.totalorder %s43_s21, %s1529_s24  ;;  %p1535_p2 = scmp.lt.s32.totalorder %s1529_s24, %s1529_s24 }
   0xe   :  { %p1536_p3 = por %p1535_p2, %p1534_p1 }
  0x10   :  { %p1537_p4 = pnand %p1536_p3, %p1530_p0 }
  0x12   :  { %1540 = shalt.err (!%p1537_p4)
}
  0x13   :  { %s1676_s0 = smov 128   ;;  %s1677_s25 = smov 8  }
  0x14   :  { %48 = dma.hbm_to_vmem [thread:$0]  %s2094_s2, 2048, %s43_s21, [#allocation11], %s1676_s0, %s1676_s0, %s1677_s25  }
  0x15   :  { %s1549_s28 = scalar_lea.vmem %s69_s23, 4096  ;;  %p1554_p6 = scmp.lt.s32.totalorder %s69_s23, %s69_s23 }
  0x16   :  { %p1550_p5 = scmp.ne.s32.totalorder %s69_s23, %s1549_s28  ;;  %p1555_p7 = scmp.lt.s32.totalorder %s1549_s28, %s1549_s28 }
  0x18   :  { %p1556_p8 = por %p1555_p7, %p1554_p6 }
  0x1a   :  { %p1557_p9 = pnand %p1556_p8, %p1550_p5 }
  0x1c   :  { %1560 = shalt.err (!%p1557_p9)
}
  0x1d   :  { %s1678_s29 = smov 256   ;;  %s1679_s30 = smov 16  }
  0x1e   :  { %74 = dma.hbm_to_vmem [thread:$0]  %s2097_s5, 4096, %s69_s23, [#allocation14], %s1678_s29, %s1678_s29, %s1679_s30  }
  0x1f   :  { %s1680_s14 = smov [#allocation7]   ;;  %s1681_s16 = smov [#allocation12]  }
  0x20   :  { %s30_s15 = sshll.u32 %s1680_s14, 4  ;;  %s54_s2 = sshll.u32 %s1681_s16, 4  ;;  %s31_s15 = int_to_ptr.vmem [resolvable:$true] %s30_s15  ;;  %s55_s2 = int_to_ptr.vmem [resolvable:$true] %s54_s2 }
  0x21   :  { %s1569_s17 = scalar_lea.vmem %s31_s15, 1024  ;;  %p1574_p11 = scmp.lt.s32.totalorder %s31_s15, %s31_s15 }
  0x22   :  { %p1570_p10 = scmp.ne.s32.totalorder %s31_s15, %s1569_s17  ;;  %p1575_p12 = scmp.lt.s32.totalorder %s1569_s17, %s1569_s17 }
  0x24   :  { %p1576_p13 = por %p1575_p12, %p1574_p11 }
  0x26   :  { %p1577_p0 = pnand %p1576_p13, %p1570_p10 }
  0x28   :  { %1580 = shalt.err (!%p1577_p0)
}
  0x29   :  { %36 = dma.hbm_to_vmem [thread:$0]  %s2093_s1, 1024, %s31_s15, [#allocation8], %s1676_s0, %s1676_s0, %s1677_s25  }
  0x2a   :  { %s1589_s20 = scalar_lea.vmem %s55_s2, 6144  ;;  %p1594_p2 = scmp.lt.s32.totalorder %s55_s2, %s55_s2 }
  0x2b   :  { %p1590_p1 = scmp.ne.s32.totalorder %s55_s2, %s1589_s20  ;;  %p1595_p3 = scmp.lt.s32.totalorder %s1589_s20, %s1589_s20 }
  0x2d   :  { %p1596_p4 = por %p1595_p3, %p1594_p2 }
  0x2f   :  { %p1597_p5 = pnand %p1596_p4, %p1590_p1 }
  0x31   :  { %1600 = shalt.err (!%p1597_p5)
}
  0x32   :  { %s1682_s5 = smov 384   ;;  %s1683_s21 = smov 24  }
  0x33   :  { %60 = dma.hbm_to_vmem [thread:$0]  %s2095_s3, 6144, %s55_s2, [#allocation11], %s1682_s5, %s1682_s5, %s1683_s21  }
  0x34   :  { %s1684_s24 = smov [#allocation15]   ;;  %s1685_s27 = smov [#allocation16]  }
  0x35   :  { %s82_s26 = sshll.u32 %s1684_s24, 4  ;;  %s96_s28 = sshll.u32 %s1685_s27, 4  ;;  %s83_s26 = int_to_ptr.vmem [resolvable:$true] %s82_s26  ;;  %s97_s28 = int_to_ptr.vmem [resolvable:$true] %s96_s28 }
  0x36   :  { %s1609_s1 = scalar_lea.vmem %s83_s26, 4096  ;;  %p1614_p7 = scmp.lt.s32.totalorder %s83_s26, %s83_s26 }
  0x37   :  { %p1610_p6 = scmp.ne.s32.totalorder %s83_s26, %s1609_s1  ;;  %p1615_p8 = scmp.lt.s32.totalorder %s1609_s1, %s1609_s1 }
  0x39   :  { %p1616_p9 = por %p1615_p8, %p1614_p7 }
  0x3b   :  { %p1617_p10 = pnand %p1616_p9, %p1610_p6 }
  0x3d   :  { %1620 = shalt.err (!%p1617_p10)
}
  0x3e   :  { %88 = dma.hbm_to_vmem [thread:$0]  %s2099_s7, 4096, %s83_s26, [#allocation14], %s1678_s29, %s1678_s29, %s1679_s30  }
  0x3f   :  { %s1629_s3 = scalar_lea.vmem %s97_s28, 4096  ;;  %p1634_p12 = scmp.lt.s32.totalorder %s97_s28, %s97_s28 }
  0x40   :  { %p1630_p11 = scmp.ne.s32.totalorder %s97_s28, %s1629_s3  ;;  %p1635_p13 = scmp.lt.s32.totalorder %s1629_s3, %s1629_s3 }
  0x42   :  { %p1636_p0 = por %p1635_p13, %p1634_p12 }
  0x44   :  { %p1637_p1 = pnand %p1636_p0, %p1630_p11 }
  0x46   :  { %1640 = shalt.err (!%p1637_p1)
}
  0x47   :  { %102 = dma.hbm_to_vmem [thread:$0]  %s2101_s9, 4096, %s97_s28, [#allocation17], %s1678_s29, %s1678_s29, %s1679_s30  }
  0x48   :  { %1663 = dma.done.wait [#allocation8], 1024  }
  0x49   :  { %1664 = vsyncadd [#allocation8], 4294966272 }
  0x4a   :  { %1665 = dma.done.wait [#allocation11], 8192  }
  0x4b   :  { %1666 = vsyncadd [#allocation11], 4294959104 }
  0x4c   :  { %1667 = dma.done.wait [#allocation14], 8192  }
  0x4d   :  { %1668 = vsyncadd [#allocation14], 4294959104 }
  0x4e   :  { %1669 = dma.done.wait [#allocation17], 4096  }
  0x4f   :  { %1670 = vsyncadd [#allocation17], 4294963200  ;;  %v1686_v0 = vmov 0.0   ;;  %s132_s7 = sld [smem:[#allocation6]]  ;;  %v267_v1 = vld [vmem:[#allocation12 + $0x170] sm:$0xff]  ;;  %v266_v2 = vld [vmem:[#allocation12 + $0x168] sm:$0xff] }
  0x50   :  { %350 = vmatprep.mubr.f32.mxu0 %v1686_v0  ;;  %123 = vst [vmem:[#allocation2] sm:$0xff] %v1686_v0  ;;  %124 = vst [vmem:[#allocation3] sm:$0xff] %v1686_v0  ;;  %1304 = vmatprep.subr.mxu1 %v1686_v0  ;;  %v264_v3 = vld [vmem:[#allocation12 + $0x158] sm:$0xff]  ;;  %s1790_s9 = sld [smem:[#allocation6 + $0x1]]  ;;  %v263_v4 = vld [vmem:[#allocation12 + $0x150] sm:$0xff]  ;;  %vm1687_vm0 = vmmov 0  }
  0x51   :  { %125 = vst [vmem:[#allocation3 + $0x8] sm:$0xff] %v1686_v0  ;;  %126 = vst [vmem:[#allocation3 + $0x10] sm:$0xff] %v1686_v0  ;;  %286 = vmatprep.subr.mxu0 %v267_v1  ;;  %v261_v5 = vld [vmem:[#allocation12 + $0x140] sm:$0xff]  ;;  %v260_v6 = vld [vmem:[#allocation12 + $0x138] sm:$0xff]  ;;  %s1792_s29 = sld [smem:[#allocation6 + $0x2]]  ;;  %1336 = vmatprep.mubr.msk.f32.mxu1 %vm1687_vm0, %v1686_v0 }
  0x52   :  { %127 = vst [vmem:[#allocation3 + $0x18] sm:$0xff] %v1686_v0  ;;  %128 = vst [vmem:[#allocation3 + $0x20] sm:$0xff] %v1686_v0  ;;  %287 = vmatpush1.msra.mxu0 %v266_v2  ;;  %v258_v7 = vld [vmem:[#allocation12 + $0x128] sm:$0xff]  ;;  %v257_v8 = vld [vmem:[#allocation12 + $0x120] sm:$0xff]  ;;  %s1794_s14 = sld [smem:[#allocation6 + $0x3]] }
  0x53   :  { %129 = vst [vmem:[#allocation4] sm:$0xff] %v1686_v0  ;;  %130 = vst [vmem:[#allocation4 + $0x8] sm:$0xff] %v1686_v0  ;;  %288 = vmatprep.subr.mxu0 %v264_v3  ;;  %v255_v9 = vld [vmem:[#allocation12 + $0x110] sm:$0xff]  ;;  %v254_v10 = vld [vmem:[#allocation12 + $0x108] sm:$0xff]  ;;  %s1797_s16 = sld [smem:[#allocation6 + $0x4]] }
  0x54   :  { %131 = vst [vmem:[#allocation4 + $0x10] sm:$0xff] %v1686_v0  ;;  %289 = vmatpush1.msra.mxu0 %v263_v4  ;;  %v252_v11 = vld [vmem:[#allocation12 + $0xf8] sm:$0xff]  ;;  %v251_v12 = vld [vmem:[#allocation12 + $0xf0] sm:$0xff]  ;;  %v249_v13 = vld [vmem:[#allocation12 + $0xe0] sm:$0xff]  ;;  %s1799_s2 = sld [smem:[#allocation6 + $0x5]] }
  0x55   :  { %290 = vmatprep.subr.mxu0 %v261_v5  ;;  %s133_s30 = scalar_lea.vmem [#allocation7], %s132_s7  ;;  %v248_v15 = vld [vmem:[#allocation12 + $0xd8] sm:$0xff]  ;;  %v246_v17 = vld [vmem:[#allocation12 + $0xc8] sm:$0xff]  ;;  %v245_v18 = vld [vmem:[#allocation12 + $0xc0] sm:$0xff]  ;;  %s1801_s17 = sld [smem:[#allocation6 + $0x6]] }
  0x56   :  { %291 = vmatpush1.msra.mxu0 %v260_v6  ;;  %v134_v14 = vld [vmem:[%s133_s30] sm:$0x1]  ;;  %s137_s15 = scalar_lea.vmem [#allocation7], %s1790_s9  ;;  %v243_v19 = vld [vmem:[#allocation12 + $0xb0] sm:$0xff]  ;;  %s1803_s18 = sld [smem:[#allocation6 + $0x7]]  ;;  %v242_v20 = vld [vmem:[#allocation12 + $0xa8] sm:$0xff] }
  0x57   :  { %292 = vmatprep.subr.mxu0 %v258_v7  ;;  %135 = vst [vmem:[#allocation2] sm:$0x1] %v134_v14  ;;  %v138_v16 = vld [vmem:[%s137_s15] sm:$0x1]  ;;  %s1805_s19 = sld [smem:[#allocation6 + $0x8]]  ;;  %v239_v22 = vld [vmem:[#allocation12 + $0x90] sm:$0xff] }
  0x58   :  { %293 = vmatpush1.msra.mxu0 %v257_v8  ;;  %139 = vst [vmem:[#allocation2 + $0x1] sm:$0x1] %v138_v16  ;;  %v240_v21 = vld [vmem:[#allocation12 + $0x98] sm:$0xff]  ;;  %s1807_s20 = sld [smem:[#allocation6 + $0x9]]  ;;  %v237_v23 = vld [vmem:[#allocation12 + $0x80] sm:$0xff]  ;;  %v234_v25 = vld [vmem:[#allocation12 + $0x68] sm:$0xff] }
  0x59   :  { %294 = vmatprep.subr.mxu0 %v255_v9  ;;  %s1809_s5 = sld [smem:[#allocation6 + $0xa]]  ;;  %v236_v24 = vld [vmem:[#allocation12 + $0x78] sm:$0xff]  ;;  %v233_v26 = vld [vmem:[#allocation12 + $0x60] sm:$0xff]  ;;  %v231_v27 = vld [vmem:[#allocation12 + $0x50] sm:$0xff]  ;;  %s141_s23 = scalar_lea.vmem [#allocation7], %s1792_s29 }
  0x5a   :  { %295 = vmatpush1.msra.mxu0 %v254_v10  ;;  %s1811_s21 = sld [smem:[#allocation6 + $0xb]]  ;;  %v142_v28 = vld [vmem:[%s141_s23] sm:$0x1]  ;;  %s145_s24 = scalar_lea.vmem [#allocation7], %s1794_s14  ;;  %v230_v30 = vld [vmem:[#allocation12 + $0x48] sm:$0xff]  ;;  %v227_v34 = vld [vmem:[#allocation12 + $0x30] sm:$0xff] }
  0x5b   :  { %296 = vmatprep.subr.mxu0 %v252_v11  ;;  %s1813_s22 = sld [smem:[#allocation6 + $0xc]]  ;;  %v146_v29 = vld [vmem:[%s145_s24] sm:$0x1]  ;;  %143 = vst [vmem:[#allocation3] sm:$0x1] %v142_v28  ;;  %s149_s27 = scalar_lea.vmem [#allocation7], %s1797_s16 }
  0x5c   :  { %297 = vmatpush1.msra.mxu0 %v251_v12  ;;  %v228_v31 = vld [vmem:[#allocation12 + $0x38] sm:$0xff]  ;;  %147 = vst [vmem:[#allocation3 + $0x1] sm:$0x1] %v146_v29  ;;  %s1817_s26 = sld [smem:[#allocation6 + $0xd]]  ;;  %s153_s28 = scalar_lea.vmem [#allocation7], %s1799_s2  ;;  %v225_v35 = vld [vmem:[#allocation12 + $0x20] sm:$0xff] }
  0x5d   :  { %298 = vmatprep.subr.mxu0 %v249_v13  ;;  %v150_v32 = vld [vmem:[%s149_s27] sm:$0x1]  ;;  %s1821_s1 = sld [smem:[#allocation6 + $0xe]]  ;;  %s157_s25 = scalar_lea.vmem [#allocation7], %s1801_s17  ;;  %v222_v39 = vld [vmem:[#allocation12 + $0x8] sm:$0xff]  ;;  %v221_v42 = vld [vmem:[#allocation12] sm:$0xff] }
  0x5e   :  { %299 = vmatpush1.msra.mxu0 %v248_v15  ;;  %v154_v33 = vld [vmem:[%s153_s28] sm:$0x1]  ;;  %151 = vst [vmem:[#allocation3 + $0x8] sm:$0x1] %v150_v32  ;;  %s1823_s0 = sld [smem:[#allocation6 + $0xf]]  ;;  %s161_s3 = scalar_lea.vmem [#allocation7], %s1803_s18 }
  0x5f   :  { %300 = vmatprep.subr.mxu0 %v246_v17  ;;  %155 = vst [vmem:[#allocation3 + $0x9] sm:$0x1] %v154_v33  ;;  %v158_v36 = vld [vmem:[%s157_s25] sm:$0x1]  ;;  %s1827_s12 = sld [smem:[#allocation6 + $0x10]]  ;;  %s165_s13 = scalar_lea.vmem [#allocation7], %s1805_s19 }
  0x60   :  { %301 = vmatpush1.msra.mxu0 %v245_v18  ;;  %v162_v37 = vld [vmem:[%s161_s3] sm:$0x1]  ;;  %159 = vst [vmem:[#allocation3 + $0x10] sm:$0x1] %v158_v36  ;;  %s169_s7 = scalar_lea.vmem [#allocation7], %s1807_s20  ;;  %s1831_s9 = sld [smem:[#allocation6 + $0x11]] }
  0x61   :  { %302 = vmatprep.subr.mxu0 %v243_v19  ;;  %v224_v38 = vld [vmem:[#allocation12 + $0x18] sm:$0xff]  ;;  %163 = vst [vmem:[#allocation3 + $0x11] sm:$0x1] %v162_v37  ;;  %s173_s29 = scalar_lea.vmem [#allocation7], %s1809_s5  ;;  %v462_v46 = vld [vmem:[#allocation13 + $0xf0] sm:$0xff]  ;;  %s177_s30 = scalar_lea.vmem [#allocation7], %s1811_s21 }
  0x62   :  { %303 = vmatpush1.msra.mxu0 %v242_v20  ;;  %v166_v40 = vld [vmem:[%s165_s13] sm:$0x1]  ;;  %v461_v48 = vld [vmem:[#allocation13 + $0xe8] sm:$0xff]  ;;  %v460_v49 = vld [vmem:[#allocation13 + $0xe0] sm:$0xff]  ;;  %s181_s14 = scalar_lea.vmem [#allocation7], %s1813_s22  ;;  %s185_s15 = scalar_lea.vmem [#allocation7], %s1817_s26 }
  0x63   :  { %304 = vmatprep.subr.mxu0 %v240_v21  ;;  %v170_v41 = vld [vmem:[%s169_s7] sm:$0x1]  ;;  %167 = vst [vmem:[#allocation3 + $0x18] sm:$0x1] %v166_v40  ;;  %v458_v51 = vld [vmem:[#allocation13 + $0xd0] sm:$0xff]  ;;  %v457_v52 = vld [vmem:[#allocation13 + $0xc8] sm:$0xff] }
  0x64   :  { %305 = vmatpush1.msra.mxu0 %v239_v22  ;;  %171 = vst [vmem:[#allocation3 + $0x19] sm:$0x1] %v170_v41  ;;  %v1833_v43 = vld [vmem:[#allocation2] sm:$0xff]  ;;  %v456_v53 = vld [vmem:[#allocation13 + $0xc0] sm:$0xff]  ;;  %s189_s16 = scalar_lea.vmem [#allocation7], %s1821_s1  ;;  %s193_s2 = scalar_lea.vmem [#allocation7], %s1823_s0 }
  0x65   :  { %306 = vmatprep.subr.mxu0 %v237_v23  ;;  %v463_v44 = vld [vmem:[#allocation13 + $0xf8] sm:$0xff]  ;;  %v454_v59 = vld [vmem:[#allocation13 + $0xb0] sm:$0xff]  ;;  %s197_s17 = scalar_lea.vmem [#allocation7], %s1827_s12  ;;  %v453_v62 = vld [vmem:[#allocation13 + $0xa8] sm:$0xff] }
  0x66   :  { %307 = vmatpush1.msra.mxu0 %v236_v24  ;;  %v174_v45 = vld [vmem:[%s173_s29] sm:$0x1]  ;;  %s201_s18 = scalar_lea.vmem [#allocation7], %s1831_s9  ;;  %v265_v1 = vld [vmem:[#allocation12 + $0x160] sm:$0xff]  ;;  %v262_v4 = vld [vmem:[#allocation12 + $0x148] sm:$0xff] }
  0x67   :  { %308 = vmatprep.subr.mxu0 %v234_v25  ;;  %175 = vst [vmem:[#allocation3 + $0x20] sm:$0x1] %v174_v45  ;;  %v178_v47 = vld [vmem:[%s177_s30] sm:$0x1]  ;;  %v452_v2 = vld [vmem:[#allocation13 + $0xa0] sm:$0xff]  ;;  %v450_v5 = vld [vmem:[#allocation13 + $0x90] sm:$0xff] }
  0x68   :  { %309 = vmatpush1.msra.mxu0 %v233_v26  ;;  %179 = vst [vmem:[#allocation3 + $0x21] sm:$0x1] %v178_v47  ;;  %v459_v50 = vld [vmem:[#allocation13 + $0xd8] sm:$0xff]  ;;  %v449_v6 = vld [vmem:[#allocation13 + $0x88] sm:$0xff]  ;;  %v259_v7 = vld [vmem:[#allocation12 + $0x130] sm:$0xff] }
  0x69   :  { %310 = vmatprep.subr.mxu0 %v231_v27  ;;  %v455_v54 = vld [vmem:[#allocation13 + $0xb8] sm:$0xff]  ;;  %v448_v8 = vld [vmem:[#allocation13 + $0x80] sm:$0xff]  ;;  %v446_v11 = vld [vmem:[#allocation13 + $0x70] sm:$0xff] }
  0x6a   :  { %311 = vmatpush1.msra.mxu0 %v230_v30  ;;  %v182_v55 = vld [vmem:[%s181_s14] sm:$0x1]  ;;  %v445_v12 = vld [vmem:[#allocation13 + $0x68] sm:$0xff]  ;;  %v253_v13 = vld [vmem:[#allocation12 + $0x100] sm:$0xff] }
  0x6b   :  { %312 = vmatprep.subr.mxu0 %v228_v31  ;;  %183 = vst [vmem:[#allocation4] sm:$0x1] %v182_v55  ;;  %v186_v56 = vld [vmem:[%s185_s15] sm:$0x1]  ;;  %v444_v14 = vld [vmem:[#allocation13 + $0x60] sm:$0xff]  ;;  %v250_v16 = vld [vmem:[#allocation12 + $0xe8] sm:$0xff] }
  0x6c   :  { %313 = vmatpush1.msra.mxu0 %v227_v34  ;;  %v190_v57 = vld [vmem:[%s189_s16] sm:$0x1]  ;;  %187 = vst [vmem:[#allocation4 + $0x1] sm:$0x1] %v186_v56  ;;  %v442_v17 = vld [vmem:[#allocation13 + $0x50] sm:$0xff]  ;;  %v441_v18 = vld [vmem:[#allocation13 + $0x48] sm:$0xff] }
  0x6d   :  { %314 = vmatprep.subr.mxu0 %v225_v35  ;;  %v194_v58 = vld [vmem:[%s193_s2] sm:$0x1]  ;;  %191 = vst [vmem:[#allocation4 + $0x8] sm:$0x1] %v190_v57  ;;  %v247_v19 = vld [vmem:[#allocation12 + $0xd0] sm:$0xff]  ;;  %v440_v20 = vld [vmem:[#allocation13 + $0x40] sm:$0xff] }
  0x6e   :  { %315 = vmatpush1.msra.mxu0 %v224_v38  ;;  %195 = vst [vmem:[#allocation4 + $0x9] sm:$0x1] %v194_v58  ;;  %v198_v60 = vld [vmem:[%s197_s17] sm:$0x1]  ;;  %v438_v23 = vld [vmem:[#allocation13 + $0x30] sm:$0xff]  ;;  %v437_v24 = vld [vmem:[#allocation13 + $0x28] sm:$0xff] }
  0x6f   :  { %316 = vmatprep.subr.mxu0 %v222_v39  ;;  %v202_v61 = vld [vmem:[%s201_s18] sm:$0x1]  ;;  %199 = vst [vmem:[#allocation4 + $0x10] sm:$0x1] %v198_v60  ;;  %v241_v25 = vld [vmem:[#allocation12 + $0xa0] sm:$0xff]  ;;  %v238_v28 = vld [vmem:[#allocation12 + $0x88] sm:$0xff] }
  0x70   :  { %317 = vmatpush1.msra.mxu0 %v221_v42  ;;  %203 = vst [vmem:[#allocation4 + $0x11] sm:$0x1] %v202_v61  ;;  %v268_v63 = vld [vmem:[#allocation12 + $0x178] sm:$0xff]  ;;  %v436_v26 = vld [vmem:[#allocation13 + $0x20] sm:$0xff]  ;;  %v434_v29 = vld [vmem:[#allocation13 + $0x10] sm:$0xff] }
  0x71   :  { %351 = vmatmul.mubr.f32.vlgmr.msra.gmra.mxu0 %v1833_v43  ;;  %476 = vmatprep.subr.mxu0 %v463_v44  ;;  %v451_v3 = vld [vmem:[#allocation13 + $0x98] sm:$0xff]  ;;  %v433_v30 = vld [vmem:[#allocation13 + $0x8] sm:$0xff]  ;;  %v235_v31 = vld [vmem:[#allocation12 + $0x70] sm:$0xff] }
  0x72   :  { %477 = vmatpush1.msra.mxu0 %v462_v46  ;;  %540 = vmatprep.mubr.f32.mxu0 %v1686_v0  ;;  %v447_v9 = vld [vmem:[#allocation13 + $0x78] sm:$0xff]  ;;  %v432_v32 = vld [vmem:[#allocation13] sm:$0xff]  ;;  %v738_v35 = vld [vmem:[#allocation15 + $0xf0] sm:$0xff] }
  0x73   :  { %478 = vmatprep.subr.mxu0 %v461_v48  ;;  %1305 = vmatpush3.msra.mxu1 %v268_v63  ;;  %v256_v10 = vld [vmem:[#allocation12 + $0x118] sm:$0xff]  ;;  %v427_v33 = vld [vmem:[#allocation3] sm:$0xff]  ;;  %v737_v36 = vld [vmem:[#allocation15 + $0xe8] sm:$0xff] }
  0x74   :  { %479 = vmatpush1.msra.mxu0 %v460_v49  ;;  %1306 = vmatprep.subr.mxu1 %v1686_v0  ;;  %v443_v15 = vld [vmem:[#allocation13 + $0x58] sm:$0xff]  ;;  %v736_v38 = vld [vmem:[#allocation15 + $0xe0] sm:$0xff]  ;;  %v428_v39 = vld [vmem:[#allocation3 + $0x8] sm:$0xff] }
  0x75   :  { %480 = vmatprep.subr.mxu0 %v459_v50  ;;  %1307 = vmatpush3.msra.mxu1 %v265_v1  ;;  %v439_v21 = vld [vmem:[#allocation13 + $0x38] sm:$0xff]  ;;  %v734_v41 = vld [vmem:[#allocation15 + $0xd0] sm:$0xff]  ;;  %v733_v42 = vld [vmem:[#allocation15 + $0xc8] sm:$0xff] }
  0x76   :  { %481 = vmatpush1.msra.mxu0 %v458_v51  ;;  %1308 = vmatprep.subr.mxu1 %v1686_v0  ;;  %v244_v22 = vld [vmem:[#allocation12 + $0xb8] sm:$0xff]  ;;  %v229_v44 = vld [vmem:[#allocation12 + $0x40] sm:$0xff]  ;;  %v429_v46 = vld [vmem:[#allocation3 + $0x10] sm:$0xff] }
  0x77   :  { %482 = vmatprep.subr.mxu0 %v457_v52  ;;  %1309 = vmatpush3.msra.mxu1 %v262_v4  ;;  %v435_v27 = vld [vmem:[#allocation13 + $0x18] sm:$0xff]  ;;  %v732_v45 = vld [vmem:[#allocation15 + $0xc0] sm:$0xff]  ;;  %v730_v48 = vld [vmem:[#allocation15 + $0xb0] sm:$0xff] }
  0x78   :  { %483 = vmatpush1.msra.mxu0 %v456_v53  ;;  %1310 = vmatprep.subr.mxu1 %v1686_v0  ;;  %v739_v34 = vld [vmem:[#allocation15 + $0xf8] sm:$0xff]  ;;  %v729_v49 = vld [vmem:[#allocation15 + $0xa8] sm:$0xff]  ;;  %v728_v50 = vld [vmem:[#allocation15 + $0xa0] sm:$0xff] }
  0x79   :  { %484 = vmatprep.subr.mxu0 %v455_v54  ;;  %1311 = vmatpush3.msra.mxu1 %v259_v7  ;;  %v232_v37 = vld [vmem:[#allocation12 + $0x58] sm:$0xff]  ;;  %v726_v53 = vld [vmem:[#allocation15 + $0x90] sm:$0xff]  ;;  %v725_v54 = vld [vmem:[#allocation15 + $0x88] sm:$0xff] }
  0x7a   :  { %485 = vmatpush1.msra.mxu0 %v454_v59  ;;  %1312 = vmatprep.subr.mxu1 %v1686_v0  ;;  %v735_v40 = vld [vmem:[#allocation15 + $0xd8] sm:$0xff]  ;;  %v724_v55 = vld [vmem:[#allocation15 + $0x80] sm:$0xff]  ;;  %v722_v58 = vld [vmem:[#allocation15 + $0x70] sm:$0xff] }
  0x7b   :  { %486 = vmatprep.subr.mxu0 %v453_v62  ;;  %1313 = vmatpush3.msra.mxu1 %v256_v10  ;;  %v731_v47 = vld [vmem:[#allocation15 + $0xb8] sm:$0xff]  ;;  %v431_v56 = vld [vmem:[#allocation3 + $0x20] sm:$0xff]  ;;  %v721_v59 = vld [vmem:[#allocation15 + $0x68] sm:$0xff] }
  0x7c   :  { %487 = vmatpush1.msra.mxu0 %v452_v2  ;;  %1314 = vmatprep.subr.mxu1 %v1686_v0  ;;  %v430_v51 = vld [vmem:[#allocation3 + $0x18] sm:$0xff]  ;;  %v720_v60 = vld [vmem:[#allocation15 + $0x60] sm:$0xff]  ;;  %v718_v62 = vld [vmem:[#allocation15 + $0x50] sm:$0xff] }
  0x7d   :  { %488 = vmatprep.subr.mxu0 %v451_v3  ;;  %1315 = vmatpush3.msra.mxu1 %v253_v13  ;;  %v727_v52 = vld [vmem:[#allocation15 + $0x98] sm:$0xff]  ;;  %v717_v63 = vld [vmem:[#allocation15 + $0x48] sm:$0xff]  ;;  %v716_v1 = vld [vmem:[#allocation15 + $0x40] sm:$0xff] }
  0x7e   :  { %489 = vmatpush1.msra.mxu0 %v450_v5  ;;  %1316 = vmatprep.subr.mxu1 %v1686_v0  ;;  %v723_v57 = vld [vmem:[#allocation15 + $0x78] sm:$0xff]  ;;  %v714_v3 = vld [vmem:[#allocation15 + $0x30] sm:$0xff]  ;;  %v713_v4 = vld [vmem:[#allocation15 + $0x28] sm:$0xff] }
  0x7f   :  { %490 = vmatprep.subr.mxu0 %v449_v6  ;;  %1317 = vmatpush3.msra.mxu1 %v250_v16  ;;  %v719_v61 = vld [vmem:[#allocation15 + $0x58] sm:$0xff]  ;;  %v712_v5 = vld [vmem:[#allocation15 + $0x20] sm:$0xff]  ;;  %v710_v7 = vld [vmem:[#allocation15 + $0x10] sm:$0xff] }
  0x80   :  { %491 = vmatpush1.msra.mxu0 %v448_v8  ;;  %1318 = vmatprep.subr.mxu1 %v1686_v0  ;;  %v715_v2 = vld [vmem:[#allocation15 + $0x38] sm:$0xff]  ;;  %v709_v8 = vld [vmem:[#allocation15 + $0x8] sm:$0xff]  ;;  %v223_v13 = vld [vmem:[#allocation12 + $0x10] sm:$0xff] }
  0x81   :  { %492 = vmatprep.subr.mxu0 %v447_v9  ;;  %1319 = vmatpush3.msra.mxu1 %v247_v19  ;;  %v711_v6 = vld [vmem:[#allocation15 + $0x18] sm:$0xff]  ;;  %v708_v9 = vld [vmem:[#allocation15] sm:$0xff]  ;;  %v705_v10 = vld [vmem:[#allocation4] sm:$0xff] }
  0x82   :  { %493 = vmatpush1.msra.mxu0 %v446_v11  ;;  %1320 = vmatprep.subr.mxu1 %v1686_v0  ;;  %v226_v11 = vld [vmem:[#allocation12 + $0x28] sm:$0xff]  ;;  %v1873_v16 = vld [vmem:[#allocation10 + $0x70] sm:$0xff] }
  0x83   :  { %494 = vmatprep.subr.mxu0 %v445_v12  ;;  %1321 = vmatpush3.msra.mxu1 %v244_v22  ;;  %v706_v12 = vld [vmem:[#allocation4 + $0x8] sm:$0xff]  ;;  %v1904_v22 = vld [vmem:[#allocation10 + $0x38] sm:$0xff] }
  0x84   :  { %495 = vmatpush1.msra.mxu0 %v444_v14  ;;  %1322 = vmatprep.subr.mxu1 %v1686_v0  ;;  %v1868_v14 = vld [vmem:[#allocation10 + $0x78] sm:$0xff]  ;;  %v1892_v19 = vld [vmem:[#allocation10 + $0x50] sm:$0xff] }
  0x85   :  { %496 = vmatprep.subr.mxu0 %v443_v15  ;;  %1323 = vmatpush3.msra.mxu1 %v241_v25  ;;  %v707_v15 = vld [vmem:[#allocation4 + $0x10] sm:$0xff]  ;;  %v1916_v25 = vld [vmem:[#allocation10 + $0x20] sm:$0xff] }
  0x86   :  { %497 = vmatpush1.msra.mxu0 %v442_v17  ;;  %1324 = vmatprep.subr.mxu1 %v1686_v0  ;;  %v1879_v17 = vld [vmem:[#allocation10 + $0x68] sm:$0xff] }
  0x87   :  { %498 = vmatprep.subr.mxu0 %v441_v18  ;;  %1325 = vmatpush3.msra.mxu1 %v238_v28  ;;  %v1888_v18 = vld [vmem:[#allocation10 + $0x58] sm:$0xff]  ;;  %v1930_v28 = vld [vmem:[#allocation10 + $0x8] sm:$0xff] }
  0x88   :  { %499 = vmatpush1.msra.mxu0 %v440_v20  ;;  %1326 = vmatprep.subr.mxu1 %v1686_v0  ;;  %v1896_v20 = vld [vmem:[#allocation10 + $0x48] sm:$0xff] }
  0x89   :  { %500 = vmatprep.subr.mxu0 %v439_v21  ;;  %1327 = vmatpush3.msra.mxu1 %v235_v31  ;;  %v1900_v21 = vld [vmem:[#allocation10 + $0x40] sm:$0xff] }
  0x8a   :  { %501 = vmatpush1.msra.mxu0 %v438_v23  ;;  %1328 = vmatprep.subr.mxu1 %v1686_v0  ;;  %v1908_v23 = vld [vmem:[#allocation10 + $0x30] sm:$0xff] }
  0x8b   :  { %502 = vmatprep.subr.mxu0 %v437_v24  ;;  %1329 = vmatpush3.msra.mxu1 %v232_v37  ;;  %v1912_v24 = vld [vmem:[#allocation10 + $0x28] sm:$0xff] }
  0x8c   :  { %503 = vmatpush1.msra.mxu0 %v436_v26  ;;  %1330 = vmatprep.subr.mxu1 %v1686_v0  ;;  %v1920_v26 = vld [vmem:[#allocation10 + $0x18] sm:$0xff] }
  0x8d   :  { %504 = vmatprep.subr.mxu0 %v435_v27  ;;  %1331 = vmatpush3.msra.mxu1 %v229_v44  ;;  %v1926_v27 = vld [vmem:[#allocation10 + $0x10] sm:$0xff] }
  0x8e   :  { %505 = vmatpush1.msra.mxu0 %v434_v29  ;;  %1332 = vmatprep.subr.mxu1 %v1686_v0  ;;  %v1934_v29 = vld [vmem:[#allocation10] sm:$0xff] }
  0x8f   :  { %506 = vmatprep.subr.mxu0 %v433_v30  ;;  %1333 = vmatpush3.msra.mxu1 %v226_v11  ;;  %v271_v30 = vlaneseq }
  0x90   :  { %507 = vmatpush1.msra.mxu0 %v432_v32  ;;  %1334 = vmatprep.subr.mxu1 %v1686_v0 }
  0x91   :  { %541 = vmatmul.mubr.f32.vlgmr.msra.gmra.mxu0 %v427_v33  ;;  %752 = vmatprep.subr.mxu0 %v739_v34  ;;  %v1938_v31 = vshrl.u32 %v271_v30, 7  ;;  %v1946_v33 = vld [vmem:[%s2096_s4] sm:$0x7] }
  0x92   :  { %753 = vmatpush1.msra.mxu0 %v738_v35  ;;  %546 = vmatprep.mubr.f32.mxu0 %v1686_v0  ;;  %v464_v35 = vld [vmem:[%s2098_s6] sm:$0x3] }
  0x93   :  { %754 = vmatprep.subr.mxu0 %v737_v36  ;;  %1335 = vmatpush3.msra.mxu1 %v223_v13  ;;  %v1941_v32 = vsub.s32 0, %v1938_v31  ;;  %v1954_v37 = vsub.s32 1, %v1938_v31 }
  0x94   :  { %755 = vmatpush1.msra.mxu0 %v736_v38  ;;  %1337 = vmatmul.mubr.f32.vlgmr.msra.gmra.mxu1 %v1833_v43  ;;  %v1883_v43 = vld [vmem:[#allocation10 + $0x60] sm:$0xff] }
  0x95   :  { %547 = vmatmul.mubr.f32.gmra.mxu0 %v428_v39  ;;  %756 = vmatprep.subr.mxu0 %v735_v40  ;;  %v274_v36 = vrot.slane %v1946_v33, %v1941_v32  ;;  %v469_v38 = vrot.slane %v464_v35, %v1941_v32  ;;  %v473_v40 = vrot.slane %v464_v35, %v1954_v37 }
  0x96   :  { %757 = vmatpush1.msra.mxu0 %v734_v41  ;;  %552 = vmatprep.mubr.f32.mxu0 %v1686_v0 }
  0x97   :  { %758 = vmatprep.subr.mxu0 %v733_v42  ;;  %1339 = vmatprep.subr.mxu1 %v1686_v0 }
  0x98   :  { %759 = vmatpush1.msra.mxu0 %v732_v45  ;;  %1340 = vmatpush3.msra.mxu1 %v1868_v14 }
  0x99   :  { %553 = vmatmul.mubr.f32.gmra.mxu0 %v429_v46  ;;  %760 = vmatprep.subr.mxu0 %v731_v47 }
  0x9a   :  { %761 = vmatpush1.msra.mxu0 %v730_v48  ;;  %558 = vmatprep.mubr.f32.mxu0 %v1686_v0 }
  0x9b   :  { %762 = vmatprep.subr.mxu0 %v729_v49  ;;  %1371 = vmatprep.mubr.msk.f32.mxu1 %vm1687_vm0, %v1686_v0 }
  0x9c   :  { %763 = vmatpush1.msra.mxu0 %v728_v50  ;;  %1341 = vmatprep.subr.mxu1 %v1686_v0 }
  0x9d   :  { %559 = vmatmul.mubr.f32.gmra.mxu0 %v430_v51  ;;  %764 = vmatprep.subr.mxu0 %v727_v52 }
  0x9e   :  { %765 = vmatpush1.msra.mxu0 %v726_v53  ;;  %564 = vmatprep.mubr.f32.mxu0 %v1686_v0 }
  0x9f   :  { %766 = vmatprep.subr.mxu0 %v725_v54  ;;  %1342 = vmatpush3.msra.mxu1 %v1873_v16 }
  0xa0   :  { %767 = vmatpush1.msra.mxu0 %v724_v55  ;;  %1343 = vmatprep.subr.mxu1 %v1686_v0 }
  0xa1   :  { %565 = vmatmul.mubr.f32.gmra.mxu0 %v431_v56  ;;  %768 = vmatprep.subr.mxu0 %v723_v57 }
  0xa2   :  { %769 = vmatpush1.msra.mxu0 %v722_v58  ;;  %816 = vmatprep.mubr.f32.mxu0 %v1686_v0 }
  0xa3   :  { %770 = vmatprep.subr.mxu0 %v721_v59  ;;  %1344 = vmatpush3.msra.mxu1 %v1879_v17 }
  0xa4   :  { %771 = vmatpush1.msra.mxu0 %v720_v60  ;;  %1345 = vmatprep.subr.mxu1 %v1686_v0 }
  0xa5   :  { %772 = vmatprep.subr.mxu0 %v719_v61  ;;  %1346 = vmatpush3.msra.mxu1 %v1883_v43 }
  0xa6   :  { %773 = vmatpush1.msra.mxu0 %v718_v62  ;;  %1347 = vmatprep.subr.mxu1 %v1686_v0 }
  0xa7   :  { %774 = vmatprep.subr.mxu0 %v717_v63  ;;  %1348 = vmatpush3.msra.mxu1 %v1888_v18 }
  0xa8   :  { %775 = vmatpush1.msra.mxu0 %v716_v1  ;;  %1349 = vmatprep.subr.mxu1 %v1686_v0 }
  0xa9   :  { %776 = vmatprep.subr.mxu0 %v715_v2  ;;  %1350 = vmatpush3.msra.mxu1 %v1892_v19 }
  0xaa   :  { %777 = vmatpush1.msra.mxu0 %v714_v3  ;;  %1351 = vmatprep.subr.mxu1 %v1686_v0 }
  0xab   :  { %778 = vmatprep.subr.mxu0 %v713_v4  ;;  %1352 = vmatpush3.msra.mxu1 %v1896_v20 }
  0xac   :  { %779 = vmatpush1.msra.mxu0 %v712_v5  ;;  %1353 = vmatprep.subr.mxu1 %v1686_v0  ;;  %v740_v5 = vld [vmem:[%s2100_s8] sm:$0x3] }
  0xad   :  { %780 = vmatprep.subr.mxu0 %v711_v6  ;;  %1354 = vmatpush3.msra.mxu1 %v1900_v21  ;;  %v278_v6 = vrot.slane %v1946_v33, %v1954_v37 }
  0xae   :  { %781 = vmatpush1.msra.mxu0 %v710_v7  ;;  %1355 = vmatprep.subr.mxu1 %v1686_v0  ;;  %v745_v7 = vrot.slane %v740_v5, %v1941_v32 }
  0xaf   :  { %782 = vmatprep.subr.mxu0 %v709_v8  ;;  %1356 = vmatpush3.msra.mxu1 %v1904_v22  ;;  %v2013_v8 = vrot.slane %v740_v5, %v1954_v37 }
  0xb0   :  { %783 = vmatpush1.msra.mxu0 %v708_v9  ;;  %1357 = vmatprep.subr.mxu1 %v1686_v0 }
  0xb1   :  { %817 = vmatmul.mubr.f32.vlgmr.msra.gmra.mxu0 %v705_v10  ;;  %1358 = vmatpush3.msra.mxu1 %v1908_v23 }
  0xb2   :  { %822 = vmatprep.mubr.f32.mxu0 %v1686_v0  ;;  %1359 = vmatprep.subr.mxu1 %v1686_v0 }
  0xb3   :  { %1360 = vmatpush3.msra.mxu1 %v1912_v24 }
  0xb4   :  { %1361 = vmatprep.subr.mxu1 %v1686_v0 }
  0xb5   :  { %823 = vmatmul.mubr.f32.gmra.mxu0 %v706_v12  ;;  %1362 = vmatpush3.msra.mxu1 %v1916_v25 }
  0xb6   :  { %828 = vmatprep.mubr.f32.mxu0 %v1686_v0  ;;  %1363 = vmatprep.subr.mxu1 %v1686_v0 }
  0xb7   :  { %1364 = vmatpush3.msra.mxu1 %v1920_v26 }
  0xb8   :  { %1365 = vmatprep.subr.mxu1 %v1686_v0 }
  0xb9   :  { %829 = vmatmul.mubr.f32.gmra.mxu0 %v707_v15  ;;  %1366 = vmatpush3.msra.mxu1 %v1926_v27 }
  0xba   :  { %1049 = vmatprep.mubr.f32.mxu0 %v1686_v0  ;;  %1367 = vmatprep.subr.mxu1 %v1686_v0 }
  0xbb   :  { %1368 = vmatpush3.msra.mxu1 %v1930_v28 }
  0xbc   :  { %1369 = vmatprep.subr.mxu1 %v1686_v0 }
  0xbd   :  { %1370 = vmatpush3.msra.mxu1 %v1934_v29 }
  0xbe   :  { %1386 = vmatprep.subr.mxu1 %v1686_v0 }
 0x131   :  { %v352_v34 = vpop.f32.mrf.mxu0 }
 0x132   :  { %v353_v42 = vadd.f32 %v352_v34, %v274_v36 }
 0x133   :  { %v1957_v39 = vpop.f32.mrf.mxu0 }
 0x134   :  { %v355_v10 = vadd.f32 %v1957_v39, %v278_v6 }
 0x151   :  { %v542_v41 = vpop.f32.mrf.mxu0 }
 0x152   :  { %v543_v44 = vadd.f32 %v542_v41, %v469_v38 }
 0x153   :  { %v544_v45 = vpop.f32.mrf.mxu0 }
 0x154   :  { %v571_v46 = vmul.f32 %v543_v44, %v353_v42  ;;  %v1960_v47 = vadd.f32 %v544_v45, %v473_v40  ;;  %v2024_v34 = vpop.f32.mrf.mxu1  ;;  %v956_v45 = vld [vmem:[#allocation16 + $0x78] sm:$0xff] }
 0x155   :  { %v548_v48 = vpop.f32.mrf.mxu0 }
 0x156   :  { %v549_v49 = vadd.f32 %v548_v48, %v469_v38  ;;  %1372 = vmatmul.mubr.f32.vlgmr.msra.gmra.mxu1 %v571_v46  ;;  %v955_v46 = vld [vmem:[#allocation16 + $0x70] sm:$0xff]  ;;  %v954_v48 = vld [vmem:[#allocation16 + $0x68] sm:$0xff] }
 0x157   :  { %v550_v50 = vpop.f32.mrf.mxu0  ;;  %1387 = vmatpush3.msra.mxu1 %v1868_v14  ;;  %1374 = vmatprep.mubr.msk.f32.mxu1 %vm1687_vm0, %v1686_v0 }
 0x158   :  { %v572_v51 = vmul.f32 %v549_v49, %v353_v42  ;;  %v1965_v52 = vadd.f32 %v550_v50, %v473_v40  ;;  %1388 = vmatprep.subr.mxu1 %v1686_v0  ;;  %v953_v49 = vld [vmem:[#allocation16 + $0x60] sm:$0xff]  ;;  %v952_v50 = vld [vmem:[#allocation16 + $0x58] sm:$0xff] }
 0x159   :  { %v554_v53 = vpop.f32.mrf.mxu0  ;;  %1389 = vmatpush3.msra.mxu1 %v1873_v16 }
 0x15a   :  { %v555_v54 = vadd.f32 %v554_v53, %v469_v38  ;;  %1375 = vmatmul.mubr.f32.gmra.mxu1 %v572_v51  ;;  %1390 = vmatprep.subr.mxu1 %v1686_v0  ;;  %v951_v51 = vld [vmem:[#allocation16 + $0x50] sm:$0xff]  ;;  %v950_v53 = vld [vmem:[#allocation16 + $0x48] sm:$0xff] }
 0x15b   :  { %v556_v55 = vpop.f32.mrf.mxu0  ;;  %1391 = vmatpush3.msra.mxu1 %v1879_v17  ;;  %1377 = vmatprep.mubr.msk.f32.mxu1 %vm1687_vm0, %v1686_v0 }
 0x15c   :  { %v573_v56 = vmul.f32 %v555_v54, %v353_v42  ;;  %v1973_v57 = vadd.f32 %v556_v55, %v473_v40  ;;  %1392 = vmatprep.subr.mxu1 %v1686_v0  ;;  %v949_v54 = vld [vmem:[#allocation16 + $0x40] sm:$0xff]  ;;  %v948_v55 = vld [vmem:[#allocation16 + $0x38] sm:$0xff] }
 0x15d   :  { %v560_v58 = vpop.f32.mrf.mxu0  ;;  %1393 = vmatpush3.msra.mxu1 %v1883_v43 }
 0x15e   :  { %v561_v59 = vadd.f32 %v560_v58, %v469_v38  ;;  %1378 = vmatmul.mubr.f32.gmra.mxu1 %v573_v56  ;;  %1394 = vmatprep.subr.mxu1 %v1686_v0  ;;  %v947_v56 = vld [vmem:[#allocation16 + $0x30] sm:$0xff]  ;;  %v946_v58 = vld [vmem:[#allocation16 + $0x28] sm:$0xff] }
 0x15f   :  { %v562_v60 = vpop.f32.mrf.mxu0  ;;  %1395 = vmatpush3.msra.mxu1 %v1888_v18  ;;  %1380 = vmatprep.mubr.msk.f32.mxu1 %vm1687_vm0, %v1686_v0 }
 0x160   :  { %v574_v61 = vmul.f32 %v561_v59, %v353_v42  ;;  %v1981_v62 = vadd.f32 %v562_v60, %v473_v40  ;;  %1396 = vmatprep.subr.mxu1 %v1686_v0  ;;  %v945_v59 = vld [vmem:[#allocation16 + $0x20] sm:$0xff]  ;;  %v944_v60 = vld [vmem:[#allocation16 + $0x18] sm:$0xff] }
 0x161   :  { %v566_v63 = vpop.f32.mrf.mxu0  ;;  %1397 = vmatpush3.msra.mxu1 %v1892_v19 }
 0x162   :  { %v567_v1 = vadd.f32 %v566_v63, %v469_v38  ;;  %1381 = vmatmul.mubr.f32.gmra.mxu1 %v574_v61  ;;  %1398 = vmatprep.subr.mxu1 %v1686_v0  ;;  %v1338_v38 = vpop.f32.mrf.mxu1  ;;  %v943_v61 = vld [vmem:[#allocation16 + $0x10] sm:$0xff]  ;;  %v942_v63 = vld [vmem:[#allocation16 + $0x8] sm:$0xff] }
 0x163   :  { %1399 = vmatpush3.msra.mxu1 %v1896_v20  ;;  %1383 = vmatprep.mubr.msk.f32.mxu1 %vm1687_vm0, %v1686_v0  ;;  %v568_v2 = vpop.f32.mrf.mxu0 }
 0x164   :  { %v575_v3 = vmul.f32 %v567_v1, %v353_v42  ;;  %1400 = vmatprep.subr.mxu1 %v1686_v0  ;;  %v1990_v4 = vadd.f32 %v568_v2, %v473_v40  ;;  %v941_v1 = vld [vmem:[#allocation16] sm:$0xff] }
 0x165   :  { %1401 = vmatpush3.msra.mxu1 %v1900_v21 }
 0x166   :  { %1384 = vmatmul.mubr.f32.gmra.mxu1 %v575_v3  ;;  %1402 = vmatprep.subr.mxu1 %v1686_v0 }
 0x167   :  { %1403 = vmatpush3.msra.mxu1 %v1904_v22  ;;  %1418 = vmatprep.mubr.msk.f32.mxu1 %vm1687_vm0, %v1686_v0 }
 0x168   :  { %1404 = vmatprep.subr.mxu1 %v1686_v0 }
 0x169   :  { %1405 = vmatpush3.msra.mxu1 %v1908_v23 }
 0x16a   :  { %1406 = vmatprep.subr.mxu1 %v1686_v0 }
 0x16b   :  { %1407 = vmatpush3.msra.mxu1 %v1912_v24 }
 0x16c   :  { %1408 = vmatprep.subr.mxu1 %v1686_v0 }
 0x16d   :  { %1409 = vmatpush3.msra.mxu1 %v1916_v25 }
 0x16e   :  { %1410 = vmatprep.subr.mxu1 %v1686_v0 }
 0x16f   :  { %1411 = vmatpush3.msra.mxu1 %v1920_v26 }
 0x170   :  { %1412 = vmatprep.subr.mxu1 %v1686_v0 }
 0x171   :  { %v818_v9 = vpop.f32.mrf.mxu0  ;;  %1413 = vmatpush3.msra.mxu1 %v1926_v27 }
 0x172   :  { %v819_v11 = vadd.f32 %v818_v9, %v745_v7  ;;  %1414 = vmatprep.subr.mxu1 %v1686_v0 }
 0x173   :  { %v820_v12 = vpop.f32.mrf.mxu0  ;;  %1415 = vmatpush3.msra.mxu1 %v1930_v28 }
 0x174   :  { %v835_v13 = vmul.f32 %v819_v11, %v355_v10  ;;  %v2020_v15 = vadd.f32 %v820_v12, %v2013_v8  ;;  %1416 = vmatprep.subr.mxu1 %v1686_v0 }
 0x175   :  { %v824_v30 = vpop.f32.mrf.mxu0  ;;  %1417 = vmatpush3.msra.mxu1 %v1934_v29 }
 0x176   :  { %v825_v35 = vadd.f32 %v824_v30, %v745_v7  ;;  %1419 = vmatmul.mubr.f32.vlgmr.msra.gmra.mxu1 %v835_v13  ;;  %1427 = vmatprep.subr.mxu1 %v1686_v0 }
 0x177   :  { %v826_v36 = vpop.f32.mrf.mxu0  ;;  %1421 = vmatprep.mubr.msk.f32.mxu1 %vm1687_vm0, %v1686_v0  ;;  %1428 = vmatpush3.msra.mxu1 %v1868_v14  ;;  %v972_v14 = vld [vmem:[#allocation16 + $0xf8] sm:$0xff] }
 0x178   :  { %v836_v39 = vmul.f32 %v825_v35, %v355_v10  ;;  %v2031_v40 = vadd.f32 %v826_v36, %v2013_v8  ;;  %1429 = vmatprep.subr.mxu1 %v1686_v0  ;;  %985 = vmatprep.subr.mxu0 %v972_v14 }
 0x179   :  { %v830_v41 = vpop.f32.mrf.mxu0  ;;  %1430 = vmatpush3.msra.mxu1 %v1873_v16  ;;  %v971_v16 = vld [vmem:[#allocation16 + $0xf0] sm:$0xff] }
 0x17a   :  { %v831_v42 = vadd.f32 %v830_v41, %v745_v7  ;;  %1422 = vmatmul.mubr.f32.gmra.mxu1 %v836_v39  ;;  %1431 = vmatprep.subr.mxu1 %v1686_v0 }
 0x17b   :  { %1424 = vmatprep.mubr.msk.f32.mxu1 %vm1687_vm0, %v1686_v0  ;;  %1432 = vmatpush3.msra.mxu1 %v1879_v17  ;;  %v970_v17 = vld [vmem:[#allocation16 + $0xe8] sm:$0xff] }
 0x17c   :  { %v837_v44 = vmul.f32 %v831_v42, %v355_v10  ;;  %1433 = vmatprep.subr.mxu1 %v1686_v0  ;;  %986 = vmatpush1.msra.mxu0 %v971_v16 }
 0x17d   :  { %1434 = vmatpush3.msra.mxu1 %v1883_v43  ;;  %987 = vmatprep.subr.mxu0 %v970_v17  ;;  %v969_v43 = vld [vmem:[#allocation16 + $0xe0] sm:$0xff] }
 0x17e   :  { %1425 = vmatmul.mubr.f32.gmra.mxu1 %v837_v44  ;;  %1435 = vmatprep.subr.mxu1 %v1686_v0 }
 0x17f   :  { %1436 = vmatpush3.msra.mxu1 %v1888_v18  ;;  %1459 = vmatprep.mubr.msk.f32.mxu1 %vm1687_vm0, %v1686_v0  ;;  %v968_v18 = vld [vmem:[#allocation16 + $0xd8] sm:$0xff] }
 0x180   :  { %1437 = vmatprep.subr.mxu1 %v1686_v0  ;;  %988 = vmatpush1.msra.mxu0 %v969_v43 }
 0x181   :  { %1438 = vmatpush3.msra.mxu1 %v1892_v19  ;;  %989 = vmatprep.subr.mxu0 %v968_v18  ;;  %v967_v19 = vld [vmem:[#allocation16 + $0xd0] sm:$0xff] }
 0x182   :  { %1439 = vmatprep.subr.mxu1 %v1686_v0  ;;  %990 = vmatpush1.msra.mxu0 %v967_v19 }
 0x183   :  { %1440 = vmatpush3.msra.mxu1 %v1896_v20  ;;  %v966_v20 = vld [vmem:[#allocation16 + $0xc8] sm:$0xff] }
 0x184   :  { %1441 = vmatprep.subr.mxu1 %v1686_v0  ;;  %991 = vmatprep.subr.mxu0 %v966_v20 }
 0x185   :  { %1442 = vmatpush3.msra.mxu1 %v1900_v21  ;;  %v965_v21 = vld [vmem:[#allocation16 + $0xc0] sm:$0xff] }
 0x186   :  { %1443 = vmatprep.subr.mxu1 %v1686_v0  ;;  %992 = vmatpush1.msra.mxu0 %v965_v21 }
 0x187   :  { %1444 = vmatpush3.msra.mxu1 %v1904_v22  ;;  %v964_v22 = vld [vmem:[#allocation16 + $0xb8] sm:$0xff] }
 0x188   :  { %1445 = vmatprep.subr.mxu1 %v1686_v0  ;;  %993 = vmatprep.subr.mxu0 %v964_v22 }
 0x189   :  { %1446 = vmatpush3.msra.mxu1 %v1908_v23  ;;  %v963_v23 = vld [vmem:[#allocation16 + $0xb0] sm:$0xff] }
 0x18a   :  { %1447 = vmatprep.subr.mxu1 %v1686_v0  ;;  %994 = vmatpush1.msra.mxu0 %v963_v23 }
 0x18b   :  { %1448 = vmatpush3.msra.mxu1 %v1912_v24  ;;  %v962_v24 = vld [vmem:[#allocation16 + $0xa8] sm:$0xff] }
 0x18c   :  { %1449 = vmatprep.subr.mxu1 %v1686_v0  ;;  %995 = vmatprep.subr.mxu0 %v962_v24 }
 0x18d   :  { %1450 = vmatpush3.msra.mxu1 %v1916_v25  ;;  %v961_v25 = vld [vmem:[#allocation16 + $0xa0] sm:$0xff] }
 0x18e   :  { %1451 = vmatprep.subr.mxu1 %v1686_v0  ;;  %996 = vmatpush1.msra.mxu0 %v961_v25 }
 0x18f   :  { %1452 = vmatpush3.msra.mxu1 %v1920_v26  ;;  %v960_v26 = vld [vmem:[#allocation16 + $0x98] sm:$0xff] }
 0x190   :  { %1453 = vmatprep.subr.mxu1 %v1686_v0  ;;  %997 = vmatprep.subr.mxu0 %v960_v26 }
 0x191   :  { %1454 = vmatpush3.msra.mxu1 %v1926_v27  ;;  %v959_v27 = vld [vmem:[#allocation16 + $0x90] sm:$0xff] }
 0x192   :  { %1455 = vmatprep.subr.mxu1 %v1686_v0  ;;  %998 = vmatpush1.msra.mxu0 %v959_v27 }
 0x193   :  { %1456 = vmatpush3.msra.mxu1 %v1930_v28  ;;  %v958_v28 = vld [vmem:[#allocation16 + $0x88] sm:$0xff] }
 0x194   :  { %1457 = vmatprep.subr.mxu1 %v1686_v0  ;;  %999 = vmatprep.subr.mxu0 %v958_v28 }
 0x195   :  { %1458 = vmatpush3.msra.mxu1 %v1934_v29  ;;  %v957_v29 = vld [vmem:[#allocation16 + $0x80] sm:$0xff] }
 0x196   :  { %1000 = vmatpush1.msra.mxu0 %v957_v29 }
 0x197   :  { %1001 = vmatprep.subr.mxu0 %v956_v45 }
 0x198   :  { %1002 = vmatpush1.msra.mxu0 %v955_v46 }
 0x199   :  { %1003 = vmatprep.subr.mxu0 %v954_v48 }
 0x19a   :  { %1004 = vmatpush1.msra.mxu0 %v953_v49 }
 0x19b   :  { %1005 = vmatprep.subr.mxu0 %v952_v50 }
 0x19c   :  { %1006 = vmatpush1.msra.mxu0 %v951_v51 }
 0x19d   :  { %1007 = vmatprep.subr.mxu0 %v950_v53 }
 0x19e   :  { %1008 = vmatpush1.msra.mxu0 %v949_v54 }
 0x19f   :  { %1009 = vmatprep.subr.mxu0 %v948_v55 }
 0x1a0   :  { %1010 = vmatpush1.msra.mxu0 %v947_v56 }
 0x1a1   :  { %1011 = vmatprep.subr.mxu0 %v946_v58 }
 0x1a2   :  { %1012 = vmatpush1.msra.mxu0 %v945_v59 }
 0x1a3   :  { %1013 = vmatprep.subr.mxu0 %v944_v60 }
 0x1a4   :  { %1014 = vmatpush1.msra.mxu0 %v943_v61 }
 0x1a5   :  { %1015 = vmatprep.subr.mxu0 %v942_v63 }
 0x1a6   :  { %1016 = vmatpush1.msra.mxu0 %v941_v1 }
 0x216   :  { %v642_v2 = vpop.f32.mrf.mxu1 }
 0x218   :  { %v1373_v3 = vpop.f32.mrf.mxu1 }
 0x21a   :  { %v647_v5 = vpop.f32.mrf.mxu1 }
 0x21b   :  { %v666_v10 = vmax.f32 %v642_v2, %v647_v5 }
 0x21c   :  { %v1376_v6 = vpop.f32.mrf.mxu1 }
 0x21e   :  { %v652_v7 = vpop.f32.mrf.mxu1 }
 0x21f   :  { %v667_v12 = vmax.f32 %v666_v10, %v652_v7 }
 0x220   :  { %v1379_v9 = vpop.f32.mrf.mxu1 }
 0x222   :  { %v657_v11 = vpop.f32.mrf.mxu1 }
 0x223   :  { %v668_v30 = vmax.f32 %v667_v12, %v657_v11 }
 0x224   :  { %v1382_v13 = vpop.f32.mrf.mxu1 }
 0x226   :  { %v662_v35 = vpop.f32.mrf.mxu1 }
 0x227   :  { %v669_v36 = vmax.f32 %v668_v30, %v662_v35 }
 0x228   :  { %v1385_v38 = vpop.f32.mrf.mxu1 }
 0x229   :  { %v670_v39 = vsub.f32 %v642_v2, %v669_v36  ;;  %v673_v41 = vsub.f32 %v647_v5, %v669_v36  ;;  %v676_v42 = vsub.f32 %v652_v7, %v669_v36  ;;  %v679_v44 = vsub.f32 %v657_v11, %v669_v36 }
 0x22a   :  { %v682_v43 = vsub.f32 %v662_v35, %v669_v36 }
 0x22b   :  { %v671_v14 = vmul.f32 1.442695, %v670_v39  ;;  %v674_v16 = vmul.f32 1.442695, %v673_v41  ;;  %v677_v17 = vmul.f32 1.442695, %v676_v42 }
 0x22c   :  { %v680_v18 = vmul.f32 1.442695, %v679_v44  ;;  %v683_v19 = vmul.f32 1.442695, %v682_v43  ;;  %v832_v44 = vpop.f32.mrf.mxu0 }
 0x22d   :  { %1484 = vpow2.f32 %v671_v14 }
 0x22e   :  { %1486 = vpow2.f32 %v674_v16 }
 0x22f   :  { %1488 = vpow2.f32 %v677_v17  ;;  %v833_v17 = vadd.f32 %v832_v44, %v2013_v8 }
 0x230   :  { %1490 = vpow2.f32 %v680_v18 }
 0x231   :  { %1492 = vpow2.f32 %v683_v19 }
 0x236   :  { %v904_v20 = vpop.f32.mrf.mxu1 }
 0x238   :  { %v1420_v21 = vpop.f32.mrf.mxu1 }
 0x239   :  { %v973_v21 = vld [vmem:[%s2102_s10] sm:$0x3]  ;;  %s1688_s10 = smov [#allocation18]  }
 0x23a   :  { %v1485_v22 = vpop.eup %1484  ;;  %v909_v23 = vpop.f32.mrf.mxu1  ;;  %s1181_s23 = sshll.u32 %s1688_s10, 4  ;;  %s1182_s23 = int_to_ptr.vmem [resolvable:$true] %s1181_s23 }
 0x23b   :  { %v1487_v24 = vpop.eup %1486  ;;  %v918_v28 = vmax.f32 %v904_v20, %v909_v23  ;;  %s1641_s24 = scalar_lea.vmem %s1182_s23, 32  ;;  %p1646_p3 = scmp.lt.s32.totalorder %s1182_s23, %s1182_s23 }
 0x23c   :  { %v685_v25 = vadd.f32 %v1487_v24, %v1485_v22  ;;  %v1423_v26 = vpop.f32.mrf.mxu1  ;;  %v1489_v27 = vpop.eup %1488  ;;  %p1642_p2 = scmp.ne.s32.totalorder %s1182_s23, %s1641_s24  ;;  %p1647_p4 = scmp.lt.s32.totalorder %s1641_s24, %s1641_s24 }
 0x23d   :  { %v1491_v46 = vpop.eup %1490 }
 0x23e   :  { %v686_v29 = vadd.f32 %v1489_v27, %v685_v25  ;;  %v914_v45 = vpop.f32.mrf.mxu1  ;;  %v1493_v51 = vpop.eup %1492  ;;  %p1648_p5 = por %p1647_p4, %p1646_p3 }
 0x23f   :  { %v919_v48 = vmax.f32 %v918_v28, %v914_v45 }
 0x240   :  { %v687_v49 = vadd.f32 %v1491_v46, %v686_v29  ;;  %v1426_v50 = vpop.f32.mrf.mxu1  ;;  %p1649_p6 = pnand %p1648_p5, %p1642_p2 }
 0x241   :  { %v920_v53 = vsub.f32 %v904_v20, %v919_v48  ;;  %v923_v54 = vsub.f32 %v909_v23, %v919_v48  ;;  %v926_v55 = vsub.f32 %v914_v45, %v919_v48  ;;  %v281_v20 = vsub.s32 2, %v1938_v31 }
 0x242   :  { %v688_v56 = vadd.f32 %v1493_v51, %v687_v49  ;;  %v978_v23 = vrot.slane %v973_v21, %v1941_v32 }
 0x243   :  { %v921_v58 = vmul.f32 1.442695, %v920_v53  ;;  %v924_v59 = vmul.f32 1.442695, %v923_v54  ;;  %v927_v60 = vmul.f32 1.442695, %v926_v55 }
 0x244   :  { %1494 = vrcp.f32 %v688_v56 }
 0x245   :  { %1496 = vpow2.f32 %v921_v58 }
 0x246   :  { %1498 = vpow2.f32 %v924_v59 }
 0x247   :  { %1500 = vpow2.f32 %v927_v60 }
 0x251   :  { %v1495_v61 = vpop.eup %1494 }
 0x252   :  { %v1497_v63 = vpop.eup %1496  ;;  %v690_v1 = vmul.f32 %v1495_v61, %v1485_v22  ;;  %v693_v2 = vmul.f32 %v1495_v61, %v1487_v24  ;;  %v696_v3 = vmul.f32 %v1495_v61, %v1489_v27  ;;  %v699_v10 = vmul.f32 %v1495_v61, %v1491_v46 }
 0x253   :  { %v1499_v5 = vpop.eup %1498  ;;  %v702_v35 = vmul.f32 %v1495_v61, %v1493_v51  ;;  %v282_v22 = vrot.slane %v1946_v33, %v281_v20 }
 0x254   :  { %v929_v6 = vadd.f32 %v1499_v5, %v1497_v63  ;;  %v691_v7 = vmul.f32 %v690_v1, %v1960_v47  ;;  %v694_v9 = vmul.f32 %v693_v2, %v1965_v52  ;;  %v1501_v11 = vpop.eup %1500  ;;  %v697_v30 = vmul.f32 %v696_v3, %v1973_v57  ;;  %v1512_v47 = vld [vmem:[#allocation2] sm:$0xff] }
 0x255   :  { %v700_v38 = vmul.f32 %v699_v10, %v1981_v62  ;;  %v703_v41 = vmul.f32 %v702_v35, %v1990_v4  ;;  %v424_v8 = vadd.f32 %v2024_v34, %v282_v22  ;;  %v982_v3 = vrot.slane %v973_v21, %v1954_v37 }
 0x256   :  { %v930_v12 = vadd.f32 %v1501_v11, %v929_v6  ;;  %v695_v13 = vadd.f32 %v694_v9, %v691_v7 }
 0x258   :  { %1502 = vrcp.f32 %v930_v12  ;;  %v698_v36 = vadd.f32 %v697_v30, %v695_v13 }
 0x25a   :  { %v701_v39 = vadd.f32 %v700_v38, %v698_v36 }
 0x25c   :  { %v704_v42 = vadd.f32 %v703_v41, %v701_v39 }
 0x25e   :  { %1050 = vmatmul.mubr.f32.vlgmr.msra.gmra.mxu0 %v704_v42 }
 0x25f   :  { %1055 = vmatprep.mubr.f32.mxu0 %v1686_v0 }
 0x262   :  { %1056 = vmatmul.mubr.f32.gmra.mxu0 %v1512_v47 }
 0x263   :  { %1061 = vmatprep.mubr.f32.mxu0 %v1686_v0 }
 0x265   :  { %v1503_v52 = vpop.eup %1502 }
 0x266   :  { %v932_v14 = vmul.f32 %v1503_v52, %v1497_v63  ;;  %v935_v57 = vmul.f32 %v1503_v52, %v1499_v5  ;;  %v938_v16 = vmul.f32 %v1503_v52, %v1501_v11 }
 0x268   :  { %v933_v62 = vmul.f32 %v932_v14, %v2020_v15  ;;  %v936_v43 = vmul.f32 %v935_v57, %v2031_v40  ;;  %v939_v18 = vmul.f32 %v938_v16, %v833_v17 }
 0x26a   :  { %v937_v4 = vadd.f32 %v936_v43, %v933_v62 }
 0x26c   :  { %v940_v19 = vadd.f32 %v939_v18, %v937_v4 }
 0x26e   :  { %1062 = vmatmul.mubr.f32.gmra.mxu0 %v940_v19 }
 0x31e   :  { %v1051_v24 = vpop.f32.mrf.mxu0 }
 0x31f   :  { %v1052_v15 = vadd.f32 %v1051_v24, %v978_v23 }
 0x320   :  { %v1053_v25 = vpop.f32.mrf.mxu0 }
 0x321   :  { %v1068_v40 = vmul.f32 %v1052_v15, %v424_v8  ;;  %v1054_v6 = vadd.f32 %v1053_v25, %v982_v3 }
 0x322   :  { %v1057_v26 = vpop.f32.mrf.mxu0 }
 0x323   :  { %v1058_v27 = vadd.f32 %v1057_v26, %v978_v23  ;;  %1460 = vmatmul.mubr.f32.vlgmr.msra.gmra.mxu1 %v1068_v40 }
 0x324   :  { %1462 = vmatprep.mubr.msk.f32.mxu1 %vm1687_vm0, %v1686_v0  ;;  %v1059_v33 = vpop.f32.mrf.mxu0 }
 0x325   :  { %v1069_v31 = vmul.f32 %v1058_v27, %v424_v8  ;;  %v1060_v9 = vadd.f32 %v1059_v33, %v982_v3 }
 0x327   :  { %1463 = vmatmul.mubr.f32.gmra.mxu1 %v1069_v31 }
 0x328   :  { %1465 = vmatprep.mubr.msk.f32.mxu1 %vm1687_vm0, %v1686_v0 }
 0x32e   :  { %v1063_v28 = vpop.f32.mrf.mxu0 }
 0x32f   :  { %v1064_v32 = vadd.f32 %v1063_v28, %v978_v23 }
 0x330   :  { %v1065_v7 = vpop.f32.mrf.mxu0 }
 0x331   :  { %v1070_v29 = vmul.f32 %v1064_v32, %v424_v8  ;;  %v1066_v13 = vadd.f32 %v1065_v7, %v982_v3 }
 0x333   :  { %1466 = vmatmul.mubr.f32.gmra.mxu1 %v1070_v29 }
 0x3e3   :  { %v1137_v34 = vpop.f32.mrf.mxu1 }
 0x3e5   :  { %v1461_v45 = vpop.f32.mrf.mxu1 }
 0x3e7   :  { %v1142_v46 = vpop.f32.mrf.mxu1 }
 0x3e8   :  { %v1151_v49 = vmax.f32 %v1137_v34, %v1142_v46 }
 0x3e9   :  { %v1464_v48 = vpop.f32.mrf.mxu1 }
 0x3f3   :  { %v1147_v50 = vpop.f32.mrf.mxu1 }
 0x3f4   :  { %v1152_v51 = vmax.f32 %v1151_v49, %v1147_v50 }
 0x3f5   :  { %v1467_v53 = vpop.f32.mrf.mxu1 }
 0x3f6   :  { %v1153_v54 = vsub.f32 %v1137_v34, %v1152_v51  ;;  %v1156_v55 = vsub.f32 %v1142_v46, %v1152_v51  ;;  %v1159_v56 = vsub.f32 %v1147_v50, %v1152_v51 }
 0x3f8   :  { %v1154_v58 = vmul.f32 1.442695, %v1153_v54  ;;  %v1157_v59 = vmul.f32 1.442695, %v1156_v55  ;;  %v1160_v60 = vmul.f32 1.442695, %v1159_v56 }
 0x3fa   :  { %1504 = vpow2.f32 %v1154_v58 }
 0x3fb   :  { %1506 = vpow2.f32 %v1157_v59 }
 0x3fc   :  { %1508 = vpow2.f32 %v1160_v60 }
 0x407   :  { %v1505_v0 = vpop.eup %1504 }
 0x408   :  { %v1507_v61 = vpop.eup %1506 }
 0x409   :  { %v1162_v63 = vadd.f32 %v1507_v61, %v1505_v0  ;;  %v1509_v1 = vpop.eup %1508 }
 0x40b   :  { %v1163_v2 = vadd.f32 %v1509_v1, %v1162_v63 }
 0x40d   :  { %1510 = vrcp.f32 %v1163_v2 }
 0x41a   :  { %v1511_v5 = vpop.eup %1510 }
 0x41b   :  { %v1165_v10 = vmul.f32 %v1511_v5, %v1505_v0  ;;  %v1168_v11 = vmul.f32 %v1511_v5, %v1507_v61  ;;  %v1171_v12 = vmul.f32 %v1511_v5, %v1509_v1 }
 0x41d   :  { %v1166_v30 = vmul.f32 %v1165_v10, %v1054_v6  ;;  %v1169_v35 = vmul.f32 %v1168_v11, %v1060_v9  ;;  %v1172_v38 = vmul.f32 %v1171_v12, %v1066_v13 }
 0x41f   :  { %v1170_v36 = vadd.f32 %v1169_v35, %v1166_v30 }
 0x421   :  { %v1173_v39 = vadd.f32 %v1172_v38, %v1170_v36 }
 0x423   :  { %1174 = vst [vmem:[#allocation18] sm:$0x3] %v1173_v39 }
 0x424   :  { %1652 = shalt.err (!%p1649_p6)
}
 0x425   :  { %1184 = dma.vmem_to_hbm [thread:$0]  %s1182_s23, 32, %s2103_s11, [#allocation9]  }
 0x426   :  { %1671 = dma.done.wait [#allocation9], 32  }
 0x427   :  { %1672 = vsyncadd [#allocation9], 4294967264 }
 0x428   :  { %1188 = vsyncpa [#allocation8], 1 }
 0x429   :  { %1189 = vsyncpa [#allocation11], 1 }
 0x42a   :  { %1190 = vsyncpa [#allocation14], 1 }
 0x42b   :  { %1191 = vsyncpa [#allocation17], 1 }
 0x42c   :  { %1192 = vsyncpa [#allocation9], 1 }

</bundles_post_ra>
